<compile_context>
chip_gen: v7x
topology: tpu7x:2x2x1
jax: 0.10.0
libtpu: 0.0.40
codegen_flags: <defaults>
</compile_context>

<pallas_src>
import math
import functools

import jax
import jax.numpy as jnp
from jax.experimental import pallas as pl
from jax.experimental.pallas import tpu as pltpu


# ------------------------------ fused kernel --------------------------------

def encoder_kernel(
        x_ref, mask_ref,
        ln1_g_ref, ln1_b_ref, wqkv_ref, bqkv_ref, wo_ref, bo_ref,
        ln2_g_ref, ln2_b_ref, w1_ref, b1_ref, w2_ref, b2_ref,
        fng_ref, fnb_ref,
        out_ref,
        y_scr,
        *, batch, seq, num_heads):
    """One layer grid step of the fused encoder.

    Refs (after squeezing the leading layer dim on the stacked weights):
      x_ref   : (B*S, D)  input activations (read only at layer == 0)
      mask_ref: (B, S, S) additive key-padding mask (finite negative)
      weights : per-layer LN / fused-QKV / out-proj / FFN params
      fng/fnb : final LayerNorm gamma/beta
      out_ref : (B*S, D)  written once, on the last layer
      y_scr   : (B*S, D)  VMEM-resident activation carried across layers
    """
    layer = pl.program_id(0)
    rows, D = x_ref.shape            # rows = batch * seq
    d_k = D // num_heads

    def layernorm(v, g, b, eps=1e-6):
        mu = jnp.mean(v, axis=-1, keepdims=True)
        var = jnp.mean((v - mu) ** 2, axis=-1, keepdims=True)
        return (v - mu) / jnp.sqrt(var + eps) * g + b

    # Load the activation slab into VMEM scratch on the first layer only.
    @pl.when(layer == 0)
    def _():
        y_scr[...] = x_ref[...].astype(jnp.float32)

    y = y_scr[...]                                           # (rows, D)

    # ---- sublayer 0: pre-LN multi-head self-attention + residual -----------
    xn = layernorm(y, ln1_g_ref[...], ln1_b_ref[...])
    # Fused QKV projection over ALL batch rows (single wide MXU matmul).
    qkv = jnp.dot(xn, wqkv_ref[...],
                  preferred_element_type=jnp.float32) + bqkv_ref[...]
    qkv3 = qkv.reshape(batch, seq, 3 * D)                    # (B, S, 3D)
    amask = mask_ref[...]        # (B, S, S), hoisted once (no per-head broadcast)
    wo = wo_ref[...]

    attn_proj = jnp.zeros((rows, D), jnp.float32)
    for hh in range(num_heads):
        c0 = hh * d_k
        qh = qkv3[:, :, c0:c0 + d_k]                 # already 1/sqrt(d_k)-scaled
        kh = qkv3[:, :, D + c0:D + c0 + d_k]
        vh = qkv3[:, :, 2 * D + c0:2 * D + c0 + d_k]
        # Batched over all batch elements in one einsum (single batch dim).
        s = jnp.einsum('bqd,bkd->bqk', qh, kh,
                       preferred_element_type=jnp.float32) + amask
        m = jnp.max(s, axis=-1, keepdims=True)
        e = jnp.exp(s - m)
        p = e / jnp.sum(e, axis=-1, keepdims=True)           # exact divide
        o_h = jnp.einsum('bqk,bkd->bqd', p, vh,
                         preferred_element_type=jnp.float32)  # (B, S, d_k)
        # Fold head-concat + output projection:
        #   concat_h(o_h) @ Wo == sum_h o_h @ Wo[h*d_k:(h+1)*d_k, :]
        attn_proj = attn_proj + jnp.dot(
            o_h.reshape(rows, d_k), wo[c0:c0 + d_k, :],
            preferred_element_type=jnp.float32)
    y = y + attn_proj + bo_ref[...]

    # ---- sublayer 1: pre-LN positionwise feed-forward + residual -----------
    xn2 = layernorm(y, ln2_g_ref[...], ln2_b_ref[...])
    hmid = jnp.dot(xn2, w1_ref[...],
                   preferred_element_type=jnp.float32) + b1_ref[...]
    hmid = jnp.maximum(hmid, 0.0)
    y = y + jnp.dot(hmid, w2_ref[...],
                    preferred_element_type=jnp.float32) + b2_ref[...]

    y_scr[...] = y

    # ---- final LayerNorm, written once on the last layer --------------------
    @pl.when(layer == pl.num_programs(0) - 1)
    def _():
        out_ref[...] = layernorm(y, fng_ref[...], fnb_ref[...]).astype(out_ref.dtype)


# ----------------------------- parameter packing -----------------------------

def pack_encoder_params(params):
    """One-time packing of per-layer params into layer-stacked tensors.

    Done at init time (not per forward call) so no weight copies are
    re-materialized in HBM on every call.
    """
    layers = params['layers']
    h = params['h']
    D = layers[0]['wq'].shape[0]
    d_k = D // h
    scale = 1.0 / math.sqrt(d_k)

    def stack(name):
        return jnp.stack([lyr[name] for lyr in layers], axis=0)

    # Fused QKV weights/bias; the attention scale is folded into Q.
    wqkv = jnp.stack(
        [jnp.concatenate([lyr['wq'] * scale, lyr['wk'], lyr['wv']], axis=1)
         for lyr in layers], axis=0)                         # (L, D, 3D)
    bqkv = jnp.stack(
        [jnp.concatenate([lyr['bq'] * scale, lyr['bk'], lyr['bv']], axis=1)
         for lyr in layers], axis=0)                         # (L, 1, 3D)

    return dict(
        h=h, num_layers=len(layers),
        ln1_g=stack('ln1_g'), ln1_b=stack('ln1_b'),
        wqkv=wqkv, bqkv=bqkv,
        wo=stack('wo'), bo=stack('bo'),
        ln2_g=stack('ln2_g'), ln2_b=stack('ln2_b'),
        w1=stack('w1'), b1=stack('b1'),
        w2=stack('w2'), b2=stack('b2'),
        norm_g=params['norm_g'], norm_b=params['norm_b'],
    )


# ----------------------------- wrapper ---------------------------------------

def encoder_forward(packed, x, mask):
    """x: (B, S, D) float32; mask: (B, 1, 1, S) bool (True => key masked)."""
    B, S, D = x.shape
    h = packed['h']
    L = packed['num_layers']
    assert S == mask.shape[-1]
    rows = B * S

    # Flatten batch*seq into the row (sublane) dim so every matmul amortizes
    # the layer weights over all rows.
    x2 = x.reshape(rows, D)

    # Tiny additive key-padding mask, pre-broadcast to (B, S, S); finite
    # negative instead of -inf (no NaN hazard from max-subtraction).
    # TODO(synk): fully-masked query rows would differ from PyTorch's NaN
    #             behavior; not exercised by key-padding masks.
    add_mask = jnp.where(mask.reshape(B, 1, S), -1e30, 0.0).astype(jnp.float32)
    add_mask = jnp.broadcast_to(add_mask, (B, S, S))

    kernel = functools.partial(encoder_kernel, batch=B, seq=S, num_heads=h)

    lay3 = lambda l: (l, 0, 0)        # per-layer stacked params
    full2 = lambda l: (0, 0)          # activations / output / final norm
    full3 = lambda l: (0, 0, 0)       # mask

    grid_spec = pltpu.PrefetchScalarGridSpec(
        num_scalar_prefetch=0,
        grid=(L,),
        in_specs=[
            pl.BlockSpec((rows, D), full2),           # x (flattened rows)
            pl.BlockSpec((B, S, S), full3),           # additive key mask
            pl.BlockSpec((None, 1, D), lay3),         # ln1 gamma
            pl.BlockSpec((None, 1, D), lay3),         # ln1 beta
            pl.BlockSpec((None, D, 3 * D), lay3),     # fused wqkv
            pl.BlockSpec((None, 1, 3 * D), lay3),     # fused bqkv
            pl.BlockSpec((None, D, D), lay3),         # wo
            pl.BlockSpec((None, 1, D), lay3),         # bo
            pl.BlockSpec((None, 1, D), lay3),         # ln2 gamma
            pl.BlockSpec((None, 1, D), lay3),         # ln2 beta
            pl.BlockSpec((None, D, 4 * D), lay3),     # w1
            pl.BlockSpec((None, 1, 4 * D), lay3),     # b1
            pl.BlockSpec((None, 4 * D, D), lay3),     # w2
            pl.BlockSpec((None, 1, D), lay3),         # b2
            pl.BlockSpec((1, D), full2),              # final norm gamma
            pl.BlockSpec((1, D), full2),              # final norm beta
        ],
        out_specs=pl.BlockSpec((rows, D), full2),
        scratch_shapes=[pltpu.VMEM((rows, D), jnp.float32)],  # resident activations
    )

    out2 = pl.pallas_call(
        kernel,
        out_shape=jax.ShapeDtypeStruct((rows, D), x.dtype),
        grid_spec=grid_spec,
        compiler_params=pltpu.CompilerParams(
            dimension_semantics=("arbitrary",),
            vmem_limit_bytes=32 * 1024 * 1024),
    )(x2, add_mask,
      packed['ln1_g'], packed['ln1_b'], packed['wqkv'], packed['bqkv'],
      packed['wo'], packed['bo'], packed['ln2_g'], packed['ln2_b'],
      packed['w1'], packed['b1'], packed['w2'], packed['b2'],
      packed['norm_g'], packed['norm_b'])

    return out2.reshape(B, S, D)


# ----------------------------- parameter setup -------------------------------

def _xavier_uniform(key, fan_in, fan_out, dtype=jnp.float32):
    limit = math.sqrt(6.0 / (fan_in + fan_out))
    # (in, out) layout so kernels do x @ w directly.
    return jax.random.uniform(key, (fan_in, fan_out), dtype, -limit, limit)


def init_encoder_params(key, num_layers, d_model, h):
    layers = []
    for _ in range(num_layers):
        keys = jax.random.split(key, 7)
        key = keys[0]
        layers.append(dict(
            ln1_g=jnp.ones((1, d_model), jnp.float32),
            ln1_b=jnp.zeros((1, d_model), jnp.float32),
            wq=_xavier_uniform(keys[1], d_model, d_model),
            bq=jnp.zeros((1, d_model), jnp.float32),
            wk=_xavier_uniform(keys[2], d_model, d_model),
            bk=jnp.zeros((1, d_model), jnp.float32),
            wv=_xavier_uniform(keys[3], d_model, d_model),
            bv=jnp.zeros((1, d_model), jnp.float32),
            wo=_xavier_uniform(keys[4], d_model, d_model),
            bo=jnp.zeros((1, d_model), jnp.float32),
            ln2_g=jnp.ones((1, d_model), jnp.float32),
            ln2_b=jnp.zeros((1, d_model), jnp.float32),
            w1=_xavier_uniform(keys[5], d_model, 4 * d_model),
            b1=jnp.zeros((1, 4 * d_model), jnp.float32),
            w2=_xavier_uniform(keys[6], 4 * d_model, d_model),
            b2=jnp.zeros((1, d_model), jnp.float32),
        ))
    return dict(
        layers=layers,
        norm_g=jnp.ones((1, d_model), jnp.float32),
        norm_b=jnp.zeros((1, d_model), jnp.float32),
        h=h,
    )


# ----------------------------- pure-JAX reference ----------------------------

def _ref_layernorm(x, g, b, eps=1e-6):
    mu = jnp.mean(x, -1, keepdims=True)
    var = jnp.mean((x - mu) ** 2, -1, keepdims=True)
    return (x - mu) / jnp.sqrt(var + eps) * g + b


def encoder_reference(params, x, mask):
    B, S, D = x.shape
    h = params['h']
    d_k = D // h
    y = x
    for L in params['layers']:
        xn = _ref_layernorm(y, L['ln1_g'].reshape(D), L['ln1_b'].reshape(D))
        q = (xn @ L['wq'] + L['bq']).reshape(B, S, h, d_k).transpose(0, 2, 1, 3)
        k = (xn @ L['wk'] + L['bk']).reshape(B, S, h, d_k).transpose(0, 2, 1, 3)
        v = (xn @ L['wv'] + L['bv']).reshape(B, S, h, d_k).transpose(0, 2, 1, 3)
        s = q @ jnp.swapaxes(k, -2, -1) / math.sqrt(d_k)
        s = jnp.where(mask, -jnp.inf, s)
        p = jax.nn.softmax(s, -1)
        a = (p @ v).transpose(0, 2, 1, 3).reshape(B, S, D)
        y = y + (a @ L['wo'] + L['bo'])
        xn = _ref_layernorm(y, L['ln2_g'].reshape(D), L['ln2_b'].reshape(D))
        y = y + (jnp.maximum(xn @ L['w1'] + L['b1'], 0.0) @ L['w2'] + L['b2'])
    return _ref_layernorm(y, params['norm_g'].reshape(D), params['norm_b'].reshape(D))


# ----------------------------------- main ------------------------------------

if __name__ == "__main__":
    B, S, d_model, h, num_layers = 2, 8, 32, 4, 2

    root = jax.random.PRNGKey(0)
    k_x, k_p = jax.random.split(root)

    x = jax.random.normal(k_x, (B, S, d_model), jnp.float32)
    # key-padding mask: (B, 1, 1, S), True = masked.  Batch 1 masks last 2 keys.
    valid_len = jnp.array([S, S - 2])
    mask = (jnp.arange(S)[None, :] >= valid_len[:, None]).reshape(B, 1, 1, S)

    params = init_encoder_params(k_p, num_layers, d_model, h)
    packed = pack_encoder_params(params)          # one-time packing, not per call

    out = jax.block_until_ready(encoder_forward(packed, x, mask))
    ref = jax.block_until_ready(encoder_reference(params, x, mask))

    assert out.shape == (B, S, d_model)
    assert jnp.allclose(out, ref, rtol=2e-3, atol=2e-3), "mismatch vs reference"

    print("KERNEL_OK")
</pallas_src>

<mosaic_0001>
module attributes {stable_mosaic.version = 11 : i64} {
  func.func @encoder_kernel(%arg0: i32, %arg1: memref<16x32xf32, #tpu.memory_space<vmem>>, %arg2: memref<2x8x8xf32, #tpu.memory_space<vmem>>, %arg3: memref<1x1x32xf32, #tpu.memory_space<vmem>>, %arg4: memref<1x1x32xf32, #tpu.memory_space<vmem>>, %arg5: memref<1x32x96xf32, #tpu.memory_space<vmem>>, %arg6: memref<1x1x96xf32, #tpu.memory_space<vmem>>, %arg7: memref<1x32x32xf32, #tpu.memory_space<vmem>>, %arg8: memref<1x1x32xf32, #tpu.memory_space<vmem>>, %arg9: memref<1x1x32xf32, #tpu.memory_space<vmem>>, %arg10: memref<1x1x32xf32, #tpu.memory_space<vmem>>, %arg11: memref<1x32x128xf32, #tpu.memory_space<vmem>>, %arg12: memref<1x1x128xf32, #tpu.memory_space<vmem>>, %arg13: memref<1x128x32xf32, #tpu.memory_space<vmem>>, %arg14: memref<1x1x32xf32, #tpu.memory_space<vmem>>, %arg15: memref<1x32xf32, #tpu.memory_space<vmem>>, %arg16: memref<1x32xf32, #tpu.memory_space<vmem>>, %arg17: memref<16x32xf32, #tpu.memory_space<vmem>>, %arg18: memref<16x32xf32, #tpu.memory_space<vmem>>) attributes {dimension_semantics = [#tpu.dimension_semantics<arbitrary>], iteration_bounds = array<i64: 2>, scalar_prefetch = 0 : i64, scratch_operands = 1 : i64, tpu.core_type = #tpu.core_type<tc>, window_params = [{pipeline_mode = #tpu.pipeline_mode<synchronous>, transform_indices = @transform_0, window_bounds = array<i64: 16, 32>}, {pipeline_mode = #tpu.pipeline_mode<synchronous>, transform_indices = @transform_1, window_bounds = array<i64: 2, 8, 8>}, {transform_indices = @transform_2, window_bounds = array<i64: 1, 1, 32>}, {transform_indices = @transform_3, window_bounds = array<i64: 1, 1, 32>}, {transform_indices = @transform_4, window_bounds = array<i64: 1, 32, 96>}, {transform_indices = @transform_5, window_bounds = array<i64: 1, 1, 96>}, {transform_indices = @transform_6, window_bounds = array<i64: 1, 32, 32>}, {transform_indices = @transform_7, window_bounds = array<i64: 1, 1, 32>}, {transform_indices = @transform_8, window_bounds = array<i64: 1, 1, 32>}, {transform_indices = @transform_9, window_bounds = array<i64: 1, 1, 32>}, {transform_indices = @transform_10, window_bounds = array<i64: 1, 32, 128>}, {transform_indices = @transform_11, window_bounds = array<i64: 1, 1, 128>}, {transform_indices = @transform_12, window_bounds = array<i64: 1, 128, 32>}, {transform_indices = @transform_13, window_bounds = array<i64: 1, 1, 32>}, {pipeline_mode = #tpu.pipeline_mode<synchronous>, transform_indices = @transform_14, window_bounds = array<i64: 1, 32>}, {pipeline_mode = #tpu.pipeline_mode<synchronous>, transform_indices = @transform_15, window_bounds = array<i64: 1, 32>}, {pipeline_mode = #tpu.pipeline_mode<synchronous>, transform_indices = @transform_16, window_bounds = array<i64: 16, 32>}]} {
    %c0_i32 = arith.constant 0 : i32
    %0 = arith.cmpi eq, %arg0, %c0_i32 : i32
    %1 = arith.extui %0 : i1 to i32
    %c0_i32_0 = arith.constant 0 : i32
    %2 = arith.cmpi ne, %1, %c0_i32_0 : i32
    scf.if %2 {
      %c0_78 = arith.constant 0 : index
      %c0_79 = arith.constant 0 : index
      %170 = vector.load %arg1[%c0_78, %c0_79] : memref<16x32xf32, #tpu.memory_space<vmem>>, vector<16x32xf32>
      %c0_80 = arith.constant 0 : index
      %c0_81 = arith.constant 0 : index
      %171 = vector.load %arg18[%c0_80, %c0_81] : memref<16x32xf32, #tpu.memory_space<vmem>>, vector<16x32xf32>
      tpu.vector_store %arg18[%c0_80, %c0_81], %170 {strides = array<i32>} : memref<16x32xf32, #tpu.memory_space<vmem>>, vector<16x32xf32>,
    } else {
    }
    %c0 = arith.constant 0 : index
    %c0_1 = arith.constant 0 : index
    %3 = vector.load %arg18[%c0, %c0_1] : memref<16x32xf32, #tpu.memory_space<vmem>>, vector<16x32xf32>
    %c0_2 = arith.constant 0 : index
    %c0_3 = arith.constant 0 : index
    %c0_4 = arith.constant 0 : index
    %4 = vector.load %arg3[%c0_2, %c0_3, %c0_4] : memref<1x1x32xf32, #tpu.memory_space<vmem>>, vector<1x1x32xf32>
    %5 = vector.shape_cast %4 : vector<1x1x32xf32> to vector<1x32xf32>
    %c0_5 = arith.constant 0 : index
    %c0_6 = arith.constant 0 : index
    %c0_7 = arith.constant 0 : index
    %6 = vector.load %arg4[%c0_5, %c0_6, %c0_7] : memref<1x1x32xf32, #tpu.memory_space<vmem>>, vector<1x1x32xf32>
    %7 = vector.shape_cast %6 : vector<1x1x32xf32> to vector<1x32xf32>
    %cst = arith.constant dense<0.000000e+00> : vector<16xf32>
    %8 = vector.multi_reduction <add>, %3, %cst [1] : vector<16x32xf32> to vector<16xf32>
    %9 = vector.shape_cast %8 : vector<16xf32> to vector<16x1xf32>
    %cst_8 = arith.constant 3.200000e+01 : f32
    %10 = vector.broadcast %cst_8 : f32 to vector<16x1xf32>
    %11 = arith.divf %9, %10 : vector<16x1xf32>
    %12 = vector.broadcast %11 : vector<16x1xf32> to vector<16x32xf32>
    %13 = arith.subf %3, %12 : vector<16x32xf32>
    %14 = arith.mulf %13, %13 : vector<16x32xf32>
    %cst_9 = arith.constant dense<0.000000e+00> : vector<16xf32>
    %15 = vector.multi_reduction <add>, %14, %cst_9 [1] : vector<16x32xf32> to vector<16xf32>
    %16 = vector.shape_cast %15 : vector<16xf32> to vector<16x1xf32>
    %cst_10 = arith.constant 3.200000e+01 : f32
    %17 = vector.broadcast %cst_10 : f32 to vector<16x1xf32>
    %18 = arith.divf %16, %17 : vector<16x1xf32>
    %19 = vector.broadcast %11 : vector<16x1xf32> to vector<16x32xf32>
    %20 = arith.subf %3, %19 : vector<16x32xf32>
    %cst_11 = arith.constant 9.99999997E-7 : f32
    %21 = vector.broadcast %cst_11 : f32 to vector<16x1xf32>
    %22 = arith.addf %18, %21 : vector<16x1xf32>
    %23 = math.sqrt %22 : vector<16x1xf32>
    %24 = vector.broadcast %23 : vector<16x1xf32> to vector<16x32xf32>
    %25 = arith.divf %20, %24 : vector<16x32xf32>
    %26 = vector.broadcast %5 : vector<1x32xf32> to vector<16x32xf32>
    %27 = arith.mulf %25, %26 : vector<16x32xf32>
    %28 = vector.broadcast %7 : vector<1x32xf32> to vector<16x32xf32>
    %29 = arith.addf %27, %28 : vector<16x32xf32>
    %c0_12 = arith.constant 0 : index
    %c0_13 = arith.constant 0 : index
    %c0_14 = arith.constant 0 : index
    %30 = vector.load %arg5[%c0_12, %c0_13, %c0_14] : memref<1x32x96xf32, #tpu.memory_space<vmem>>, vector<1x32x96xf32>
    %31 = vector.shape_cast %30 : vector<1x32x96xf32> to vector<32x96xf32>
    %cst_15 = arith.constant dense<0.000000e+00> : vector<16x96xf32>
    %32 = tpu.matmul %29, %31, %cst_15 {dimension_numbers = #tpu.dot_dimension_numbers<[1], [0], [0], [1], [0, 0, 1, 1], [], []>} : vector<16x32xf32>, vector<32x96xf32>, vector<16x96xf32> -> vector<16x96xf32>
    %c0_16 = arith.constant 0 : index
    %c0_17 = arith.constant 0 : index
    %c0_18 = arith.constant 0 : index
    %33 = vector.load %arg6[%c0_16, %c0_17, %c0_18] : memref<1x1x96xf32, #tpu.memory_space<vmem>>, vector<1x1x96xf32>
    %34 = vector.shape_cast %33 : vector<1x1x96xf32> to vector<1x96xf32>
    %35 = vector.broadcast %34 : vector<1x96xf32> to vector<16x96xf32>
    %36 = arith.addf %32, %35 : vector<16x96xf32>
    %37 = vector.shape_cast %36 : vector<16x96xf32> to vector<2x8x96xf32>
    %c0_19 = arith.constant 0 : index
    %c0_20 = arith.constant 0 : index
    %c0_21 = arith.constant 0 : index
    %38 = vector.load %arg2[%c0_19, %c0_20, %c0_21] : memref<2x8x8xf32, #tpu.memory_space<vmem>>, vector<2x8x8xf32>
    %c0_22 = arith.constant 0 : index
    %c0_23 = arith.constant 0 : index
    %c0_24 = arith.constant 0 : index
    %39 = vector.load %arg7[%c0_22, %c0_23, %c0_24] : memref<1x32x32xf32, #tpu.memory_space<vmem>>, vector<1x32x32xf32>
    %40 = vector.shape_cast %39 : vector<1x32x32xf32> to vector<32x32xf32>
    %cst_25 = arith.constant 0.000000e+00 : f32
    %41 = vector.broadcast %cst_25 : f32 to vector<16x32xf32>
    %42 = vector.extract_strided_slice %37 {offsets = [0, 0, 0], sizes = [2, 8, 8], strides = [1, 1, 1]} : vector<2x8x96xf32> to vector<2x8x8xf32>
    %43 = vector.extract_strided_slice %37 {offsets = [0, 0, 32], sizes = [2, 8, 8], strides = [1, 1, 1]} : vector<2x8x96xf32> to vector<2x8x8xf32>
    %44 = vector.extract_strided_slice %37 {offsets = [0, 0, 64], sizes = [2, 8, 8], strides = [1, 1, 1]} : vector<2x8x96xf32> to vector<2x8x8xf32>
    "tpu.trace_start"() <{level = 10 : i32, message = "bqd,bkd->bqk"}> : () -> ()
    %cst_26 = arith.constant dense<0.000000e+00> : vector<2x8x8xf32>
    %45 = tpu.matmul %42, %43, %cst_26 {dimension_numbers = #tpu.dot_dimension_numbers<[2], [2], [1], [1], [0, 0, 0, 1, 1, 1], [0], [0]>} : vector<2x8x8xf32>, vector<2x8x8xf32>, vector<2x8x8xf32> -> vector<2x8x8xf32>
    "tpu.trace_stop"() : () -> ()
    %46 = arith.addf %45, %38 : vector<2x8x8xf32>
    %cst_27 = arith.constant dense<0xFF800000> : vector<2x8xf32>
    %47 = vector.multi_reduction <maximumf>, %46, %cst_27 [2] : vector<2x8x8xf32> to vector<2x8xf32>
    %48 = vector.shape_cast %47 : vector<2x8xf32> to vector<2x8x1xf32>
    %49 = vector.broadcast %48 : vector<2x8x1xf32> to vector<2x8x8xf32>
    %50 = arith.subf %46, %49 : vector<2x8x8xf32>
    %51 = math.exp %50 : vector<2x8x8xf32>
    %cst_28 = arith.constant dense<0.000000e+00> : vector<2x8xf32>
    %52 = vector.multi_reduction <add>, %51, %cst_28 [2] : vector<2x8x8xf32> to vector<2x8xf32>
    %53 = vector.shape_cast %52 : vector<2x8xf32> to vector<2x8x1xf32>
    %54 = vector.broadcast %53 : vector<2x8x1xf32> to vector<2x8x8xf32>
    %55 = arith.divf %51, %54 : vector<2x8x8xf32>
    "tpu.trace_start"() <{level = 10 : i32, message = "bqk,bkd->bqd"}> : () -> ()
    %cst_29 = arith.constant dense<0.000000e+00> : vector<2x8x8xf32>
    %56 = tpu.matmul %55, %44, %cst_29 {dimension_numbers = #tpu.dot_dimension_numbers<[2], [1], [1], [2], [0, 0, 0, 1, 1, 2], [0], [0]>} : vector<2x8x8xf32>, vector<2x8x8xf32>, vector<2x8x8xf32> -> vector<2x8x8xf32>
    "tpu.trace_stop"() : () -> ()
    %57 = vector.shape_cast %56 : vector<2x8x8xf32> to vector<16x8xf32>
    %58 = vector.extract_strided_slice %40 {offsets = [0, 0], sizes = [8, 32], strides = [1, 1]} : vector<32x32xf32> to vector<8x32xf32>
    %cst_30 = arith.constant dense<0.000000e+00> : vector<16x32xf32>
    %59 = tpu.matmul %57, %58, %cst_30 {dimension_numbers = #tpu.dot_dimension_numbers<[1], [0], [0], [1], [0, 0, 1, 1], [], []>} : vector<16x8xf32>, vector<8x32xf32>, vector<16x32xf32> -> vector<16x32xf32>
    %60 = arith.addf %41, %59 : vector<16x32xf32>
    %61 = vector.extract_strided_slice %37 {offsets = [0, 0, 8], sizes = [2, 8, 8], strides = [1, 1, 1]} : vector<2x8x96xf32> to vector<2x8x8xf32>
    %62 = vector.extract_strided_slice %37 {offsets = [0, 0, 40], sizes = [2, 8, 8], strides = [1, 1, 1]} : vector<2x8x96xf32> to vector<2x8x8xf32>
    %63 = vector.extract_strided_slice %37 {offsets = [0, 0, 72], sizes = [2, 8, 8], strides = [1, 1, 1]} : vector<2x8x96xf32> to vector<2x8x8xf32>
    "tpu.trace_start"() <{level = 10 : i32, message = "bqd,bkd->bqk"}> : () -> ()
    %cst_31 = arith.constant dense<0.000000e+00> : vector<2x8x8xf32>
    %64 = tpu.matmul %61, %62, %cst_31 {dimension_numbers = #tpu.dot_dimension_numbers<[2], [2], [1], [1], [0, 0, 0, 1, 1, 1], [0], [0]>} : vector<2x8x8xf32>, vector<2x8x8xf32>, vector<2x8x8xf32> -> vector<2x8x8xf32>
    "tpu.trace_stop"() : () -> ()
    %65 = arith.addf %64, %38 : vector<2x8x8xf32>
    %cst_32 = arith.constant dense<0xFF800000> : vector<2x8xf32>
    %66 = vector.multi_reduction <maximumf>, %65, %cst_32 [2] : vector<2x8x8xf32> to vector<2x8xf32>
    %67 = vector.shape_cast %66 : vector<2x8xf32> to vector<2x8x1xf32>
    %68 = vector.broadcast %67 : vector<2x8x1xf32> to vector<2x8x8xf32>
    %69 = arith.subf %65, %68 : vector<2x8x8xf32>
    %70 = math.exp %69 : vector<2x8x8xf32>
    %cst_33 = arith.constant dense<0.000000e+00> : vector<2x8xf32>
    %71 = vector.multi_reduction <add>, %70, %cst_33 [2] : vector<2x8x8xf32> to vector<2x8xf32>
    %72 = vector.shape_cast %71 : vector<2x8xf32> to vector<2x8x1xf32>
    %73 = vector.broadcast %72 : vector<2x8x1xf32> to vector<2x8x8xf32>
    %74 = arith.divf %70, %73 : vector<2x8x8xf32>
    "tpu.trace_start"() <{level = 10 : i32, message = "bqk,bkd->bqd"}> : () -> ()
    %cst_34 = arith.constant dense<0.000000e+00> : vector<2x8x8xf32>
    %75 = tpu.matmul %74, %63, %cst_34 {dimension_numbers = #tpu.dot_dimension_numbers<[2], [1], [1], [2], [0, 0, 0, 1, 1, 2], [0], [0]>} : vector<2x8x8xf32>, vector<2x8x8xf32>, vector<2x8x8xf32> -> vector<2x8x8xf32>
    "tpu.trace_stop"() : () -> ()
    %76 = vector.shape_cast %75 : vector<2x8x8xf32> to vector<16x8xf32>
    %77 = vector.extract_strided_slice %40 {offsets = [8, 0], sizes = [8, 32], strides = [1, 1]} : vector<32x32xf32> to vector<8x32xf32>
    %cst_35 = arith.constant dense<0.000000e+00> : vector<16x32xf32>
    %78 = tpu.matmul %76, %77, %cst_35 {dimension_numbers = #tpu.dot_dimension_numbers<[1], [0], [0], [1], [0, 0, 1, 1], [], []>} : vector<16x8xf32>, vector<8x32xf32>, vector<16x32xf32> -> vector<16x32xf32>
    %79 = arith.addf %60, %78 : vector<16x32xf32>
    %80 = vector.extract_strided_slice %37 {offsets = [0, 0, 16], sizes = [2, 8, 8], strides = [1, 1, 1]} : vector<2x8x96xf32> to vector<2x8x8xf32>
    %81 = vector.extract_strided_slice %37 {offsets = [0, 0, 48], sizes = [2, 8, 8], strides = [1, 1, 1]} : vector<2x8x96xf32> to vector<2x8x8xf32>
    %82 = vector.extract_strided_slice %37 {offsets = [0, 0, 80], sizes = [2, 8, 8], strides = [1, 1, 1]} : vector<2x8x96xf32> to vector<2x8x8xf32>
    "tpu.trace_start"() <{level = 10 : i32, message = "bqd,bkd->bqk"}> : () -> ()
    %cst_36 = arith.constant dense<0.000000e+00> : vector<2x8x8xf32>
    %83 = tpu.matmul %80, %81, %cst_36 {dimension_numbers = #tpu.dot_dimension_numbers<[2], [2], [1], [1], [0, 0, 0, 1, 1, 1], [0], [0]>} : vector<2x8x8xf32>, vector<2x8x8xf32>, vector<2x8x8xf32> -> vector<2x8x8xf32>
    "tpu.trace_stop"() : () -> ()
    %84 = arith.addf %83, %38 : vector<2x8x8xf32>
    %cst_37 = arith.constant dense<0xFF800000> : vector<2x8xf32>
    %85 = vector.multi_reduction <maximumf>, %84, %cst_37 [2] : vector<2x8x8xf32> to vector<2x8xf32>
    %86 = vector.shape_cast %85 : vector<2x8xf32> to vector<2x8x1xf32>
    %87 = vector.broadcast %86 : vector<2x8x1xf32> to vector<2x8x8xf32>
    %88 = arith.subf %84, %87 : vector<2x8x8xf32>
    %89 = math.exp %88 : vector<2x8x8xf32>
    %cst_38 = arith.constant dense<0.000000e+00> : vector<2x8xf32>
    %90 = vector.multi_reduction <add>, %89, %cst_38 [2] : vector<2x8x8xf32> to vector<2x8xf32>
    %91 = vector.shape_cast %90 : vector<2x8xf32> to vector<2x8x1xf32>
    %92 = vector.broadcast %91 : vector<2x8x1xf32> to vector<2x8x8xf32>
    %93 = arith.divf %89, %92 : vector<2x8x8xf32>
    "tpu.trace_start"() <{level = 10 : i32, message = "bqk,bkd->bqd"}> : () -> ()
    %cst_39 = arith.constant dense<0.000000e+00> : vector<2x8x8xf32>
    %94 = tpu.matmul %93, %82, %cst_39 {dimension_numbers = #tpu.dot_dimension_numbers<[2], [1], [1], [2], [0, 0, 0, 1, 1, 2], [0], [0]>} : vector<2x8x8xf32>, vector<2x8x8xf32>, vector<2x8x8xf32> -> vector<2x8x8xf32>
    "tpu.trace_stop"() : () -> ()
    %95 = vector.shape_cast %94 : vector<2x8x8xf32> to vector<16x8xf32>
    %96 = vector.extract_strided_slice %40 {offsets = [16, 0], sizes = [8, 32], strides = [1, 1]} : vector<32x32xf32> to vector<8x32xf32>
    %cst_40 = arith.constant dense<0.000000e+00> : vector<16x32xf32>
    %97 = tpu.matmul %95, %96, %cst_40 {dimension_numbers = #tpu.dot_dimension_numbers<[1], [0], [0], [1], [0, 0, 1, 1], [], []>} : vector<16x8xf32>, vector<8x32xf32>, vector<16x32xf32> -> vector<16x32xf32>
    %98 = arith.addf %79, %97 : vector<16x32xf32>
    %99 = vector.extract_strided_slice %37 {offsets = [0, 0, 24], sizes = [2, 8, 8], strides = [1, 1, 1]} : vector<2x8x96xf32> to vector<2x8x8xf32>
    %100 = vector.extract_strided_slice %37 {offsets = [0, 0, 56], sizes = [2, 8, 8], strides = [1, 1, 1]} : vector<2x8x96xf32> to vector<2x8x8xf32>
    %101 = vector.extract_strided_slice %37 {offsets = [0, 0, 88], sizes = [2, 8, 8], strides = [1, 1, 1]} : vector<2x8x96xf32> to vector<2x8x8xf32>
    "tpu.trace_start"() <{level = 10 : i32, message = "bqd,bkd->bqk"}> : () -> ()
    %cst_41 = arith.constant dense<0.000000e+00> : vector<2x8x8xf32>
    %102 = tpu.matmul %99, %100, %cst_41 {dimension_numbers = #tpu.dot_dimension_numbers<[2], [2], [1], [1], [0, 0, 0, 1, 1, 1], [0], [0]>} : vector<2x8x8xf32>, vector<2x8x8xf32>, vector<2x8x8xf32> -> vector<2x8x8xf32>
    "tpu.trace_stop"() : () -> ()
    %103 = arith.addf %102, %38 : vector<2x8x8xf32>
    %cst_42 = arith.constant dense<0xFF800000> : vector<2x8xf32>
    %104 = vector.multi_reduction <maximumf>, %103, %cst_42 [2] : vector<2x8x8xf32> to vector<2x8xf32>
    %105 = vector.shape_cast %104 : vector<2x8xf32> to vector<2x8x1xf32>
    %106 = vector.broadcast %105 : vector<2x8x1xf32> to vector<2x8x8xf32>
    %107 = arith.subf %103, %106 : vector<2x8x8xf32>
    %108 = math.exp %107 : vector<2x8x8xf32>
    %cst_43 = arith.constant dense<0.000000e+00> : vector<2x8xf32>
    %109 = vector.multi_reduction <add>, %108, %cst_43 [2] : vector<2x8x8xf32> to vector<2x8xf32>
    %110 = vector.shape_cast %109 : vector<2x8xf32> to vector<2x8x1xf32>
    %111 = vector.broadcast %110 : vector<2x8x1xf32> to vector<2x8x8xf32>
    %112 = arith.divf %108, %111 : vector<2x8x8xf32>
    "tpu.trace_start"() <{level = 10 : i32, message = "bqk,bkd->bqd"}> : () -> ()
    %cst_44 = arith.constant dense<0.000000e+00> : vector<2x8x8xf32>
    %113 = tpu.matmul %112, %101, %cst_44 {dimension_numbers = #tpu.dot_dimension_numbers<[2], [1], [1], [2], [0, 0, 0, 1, 1, 2], [0], [0]>} : vector<2x8x8xf32>, vector<2x8x8xf32>, vector<2x8x8xf32> -> vector<2x8x8xf32>
    "tpu.trace_stop"() : () -> ()
    %114 = vector.shape_cast %113 : vector<2x8x8xf32> to vector<16x8xf32>
    %115 = vector.extract_strided_slice %40 {offsets = [24, 0], sizes = [8, 32], strides = [1, 1]} : vector<32x32xf32> to vector<8x32xf32>
    %cst_45 = arith.constant dense<0.000000e+00> : vector<16x32xf32>
    %116 = tpu.matmul %114, %115, %cst_45 {dimension_numbers = #tpu.dot_dimension_numbers<[1], [0], [0], [1], [0, 0, 1, 1], [], []>} : vector<16x8xf32>, vector<8x32xf32>, vector<16x32xf32> -> vector<16x32xf32>
    %117 = arith.addf %98, %116 : vector<16x32xf32>
    %118 = arith.addf %3, %117 : vector<16x32xf32>
    %c0_46 = arith.constant 0 : index
    %c0_47 = arith.constant 0 : index
    %c0_48 = arith.constant 0 : index
    %119 = vector.load %arg8[%c0_46, %c0_47, %c0_48] : memref<1x1x32xf32, #tpu.memory_space<vmem>>, vector<1x1x32xf32>
    %120 = vector.shape_cast %119 : vector<1x1x32xf32> to vector<1x32xf32>
    %121 = vector.broadcast %120 : vector<1x32xf32> to vector<16x32xf32>
    %122 = arith.addf %118, %121 : vector<16x32xf32>
    %c0_49 = arith.constant 0 : index
    %c0_50 = arith.constant 0 : index
    %c0_51 = arith.constant 0 : index
    %123 = vector.load %arg9[%c0_49, %c0_50, %c0_51] : memref<1x1x32xf32, #tpu.memory_space<vmem>>, vector<1x1x32xf32>
    %124 = vector.shape_cast %123 : vector<1x1x32xf32> to vector<1x32xf32>
    %c0_52 = arith.constant 0 : index
    %c0_53 = arith.constant 0 : index
    %c0_54 = arith.constant 0 : index
    %125 = vector.load %arg10[%c0_52, %c0_53, %c0_54] : memref<1x1x32xf32, #tpu.memory_space<vmem>>, vector<1x1x32xf32>
    %126 = vector.shape_cast %125 : vector<1x1x32xf32> to vector<1x32xf32>
    %cst_55 = arith.constant dense<0.000000e+00> : vector<16xf32>
    %127 = vector.multi_reduction <add>, %122, %cst_55 [1] : vector<16x32xf32> to vector<16xf32>
    %128 = vector.shape_cast %127 : vector<16xf32> to vector<16x1xf32>
    %cst_56 = arith.constant 3.200000e+01 : f32
    %129 = vector.broadcast %cst_56 : f32 to vector<16x1xf32>
    %130 = arith.divf %128, %129 : vector<16x1xf32>
    %131 = vector.broadcast %130 : vector<16x1xf32> to vector<16x32xf32>
    %132 = arith.subf %122, %131 : vector<16x32xf32>
    %133 = arith.mulf %132, %132 : vector<16x32xf32>
    %cst_57 = arith.constant dense<0.000000e+00> : vector<16xf32>
    %134 = vector.multi_reduction <add>, %133, %cst_57 [1] : vector<16x32xf32> to vector<16xf32>
    %135 = vector.shape_cast %134 : vector<16xf32> to vector<16x1xf32>
    %cst_58 = arith.constant 3.200000e+01 : f32
    %136 = vector.broadcast %cst_58 : f32 to vector<16x1xf32>
    %137 = arith.divf %135, %136 : vector<16x1xf32>
    %138 = vector.broadcast %130 : vector<16x1xf32> to vector<16x32xf32>
    %139 = arith.subf %122, %138 : vector<16x32xf32>
    %cst_59 = arith.constant 9.99999997E-7 : f32
    %140 = vector.broadcast %cst_59 : f32 to vector<16x1xf32>
    %141 = arith.addf %137, %140 : vector<16x1xf32>
    %142 = math.sqrt %141 : vector<16x1xf32>
    %143 = vector.broadcast %142 : vector<16x1xf32> to vector<16x32xf32>
    %144 = arith.divf %139, %143 : vector<16x32xf32>
    %145 = vector.broadcast %124 : vector<1x32xf32> to vector<16x32xf32>
    %146 = arith.mulf %144, %145 : vector<16x32xf32>
    %147 = vector.broadcast %126 : vector<1x32xf32> to vector<16x32xf32>
    %148 = arith.addf %146, %147 : vector<16x32xf32>
    %c0_60 = arith.constant 0 : index
    %c0_61 = arith.constant 0 : index
    %c0_62 = arith.constant 0 : index
    %149 = vector.load %arg11[%c0_60, %c0_61, %c0_62] : memref<1x32x128xf32, #tpu.memory_space<vmem>>, vector<1x32x128xf32>
    %150 = vector.shape_cast %149 : vector<1x32x128xf32> to vector<32x128xf32>
    %cst_63 = arith.constant dense<0.000000e+00> : vector<16x128xf32>
    %151 = tpu.matmul %148, %150, %cst_63 {dimension_numbers = #tpu.dot_dimension_numbers<[1], [0], [0], [1], [0, 0, 1, 1], [], []>} : vector<16x32xf32>, vector<32x128xf32>, vector<16x128xf32> -> vector<16x128xf32>
    %c0_64 = arith.constant 0 : index
    %c0_65 = arith.constant 0 : index
    %c0_66 = arith.constant 0 : index
    %152 = vector.load %arg12[%c0_64, %c0_65, %c0_66] : memref<1x1x128xf32, #tpu.memory_space<vmem>>, vector<1x1x128xf32>
    %153 = vector.shape_cast %152 : vector<1x1x128xf32> to vector<1x128xf32>
    %154 = vector.broadcast %153 : vector<1x128xf32> to vector<16x128xf32>
    %155 = arith.addf %151, %154 : vector<16x128xf32>
    %cst_67 = arith.constant 0.000000e+00 : f32
    %156 = vector.broadcast %cst_67 : f32 to vector<16x128xf32>
    %157 = arith.maximumf %155, %156 : vector<16x128xf32>
    %c0_68 = arith.constant 0 : index
    %c0_69 = arith.constant 0 : index
    %c0_70 = arith.constant 0 : index
    %158 = vector.load %arg13[%c0_68, %c0_69, %c0_70] : memref<1x128x32xf32, #tpu.memory_space<vmem>>, vector<1x128x32xf32>
    %159 = vector.shape_cast %158 : vector<1x128x32xf32> to vector<128x32xf32>
    %cst_71 = arith.constant dense<0.000000e+00> : vector<16x32xf32>
    %160 = tpu.matmul %157, %159, %cst_71 {dimension_numbers = #tpu.dot_dimension_numbers<[1], [0], [0], [1], [0, 0, 1, 1], [], []>} : vector<16x128xf32>, vector<128x32xf32>, vector<16x32xf32> -> vector<16x32xf32>
    %161 = arith.addf %122, %160 : vector<16x32xf32>
    %c0_72 = arith.constant 0 : index
    %c0_73 = arith.constant 0 : index
    %c0_74 = arith.constant 0 : index
    %162 = vector.load %arg14[%c0_72, %c0_73, %c0_74] : memref<1x1x32xf32, #tpu.memory_space<vmem>>, vector<1x1x32xf32>
    %163 = vector.shape_cast %162 : vector<1x1x32xf32> to vector<1x32xf32>
    %164 = vector.broadcast %163 : vector<1x32xf32> to vector<16x32xf32>
    %165 = arith.addf %161, %164 : vector<16x32xf32>
    %c0_75 = arith.constant 0 : index
    %c0_76 = arith.constant 0 : index
    %166 = vector.load %arg18[%c0_75, %c0_76] : memref<16x32xf32, #tpu.memory_space<vmem>>, vector<16x32xf32>
    tpu.vector_store %arg18[%c0_75, %c0_76], %165 {strides = array<i32>} : memref<16x32xf32, #tpu.memory_space<vmem>>, vector<16x32xf32>,
    %c1_i32 = arith.constant 1 : i32
    %167 = arith.cmpi eq, %arg0, %c1_i32 : i32
    %168 = arith.extui %167 : i1 to i32
    %c0_i32_77 = arith.constant 0 : i32
    %169 = arith.cmpi ne, %168, %c0_i32_77 : i32
    scf.if %169 {
      %c0_78 = arith.constant 0 : index
      %c0_79 = arith.constant 0 : index
      %170 = vector.load %arg15[%c0_78, %c0_79] : memref<1x32xf32, #tpu.memory_space<vmem>>, vector<1x32xf32>
      %c0_80 = arith.constant 0 : index
      %c0_81 = arith.constant 0 : index
      %171 = vector.load %arg16[%c0_80, %c0_81] : memref<1x32xf32, #tpu.memory_space<vmem>>, vector<1x32xf32>
      %cst_82 = arith.constant dense<0.000000e+00> : vector<16xf32>
      %172 = vector.multi_reduction <add>, %165, %cst_82 [1] : vector<16x32xf32> to vector<16xf32>
      %173 = vector.shape_cast %172 : vector<16xf32> to vector<16x1xf32>
      %cst_83 = arith.constant 3.200000e+01 : f32
      %174 = vector.broadcast %cst_83 : f32 to vector<16x1xf32>
      %175 = arith.divf %173, %174 : vector<16x1xf32>
      %176 = vector.broadcast %175 : vector<16x1xf32> to vector<16x32xf32>
      %177 = arith.subf %165, %176 : vector<16x32xf32>
      %178 = arith.mulf %177, %177 : vector<16x32xf32>
      %cst_84 = arith.constant dense<0.000000e+00> : vector<16xf32>
      %179 = vector.multi_reduction <add>, %178, %cst_84 [1] : vector<16x32xf32> to vector<16xf32>
      %180 = vector.shape_cast %179 : vector<16xf32> to vector<16x1xf32>
      %cst_85 = arith.constant 3.200000e+01 : f32
      %181 = vector.broadcast %cst_85 : f32 to vector<16x1xf32>
      %182 = arith.divf %180, %181 : vector<16x1xf32>
      %183 = vector.broadcast %175 : vector<16x1xf32> to vector<16x32xf32>
      %184 = arith.subf %165, %183 : vector<16x32xf32>
      %cst_86 = arith.constant 9.99999997E-7 : f32
      %185 = vector.broadcast %cst_86 : f32 to vector<16x1xf32>
      %186 = arith.addf %182, %185 : vector<16x1xf32>
      %187 = math.sqrt %186 : vector<16x1xf32>
      %188 = vector.broadcast %187 : vector<16x1xf32> to vector<16x32xf32>
      %189 = arith.divf %184, %188 : vector<16x32xf32>
      %190 = vector.broadcast %170 : vector<1x32xf32> to vector<16x32xf32>
      %191 = arith.mulf %189, %190 : vector<16x32xf32>
      %192 = vector.broadcast %171 : vector<1x32xf32> to vector<16x32xf32>
      %193 = arith.addf %191, %192 : vector<16x32xf32>
      %c0_87 = arith.constant 0 : index
      %c0_88 = arith.constant 0 : index
      %194 = vector.load %arg17[%c0_87, %c0_88] : memref<16x32xf32, #tpu.memory_space<vmem>>, vector<16x32xf32>
      tpu.vector_store %arg17[%c0_87, %c0_88], %193 {strides = array<i32>} : memref<16x32xf32, #tpu.memory_space<vmem>>, vector<16x32xf32>,
    } else {
    }
    return
  }
  func.func @transform_0(%arg0: i32) -> (i32, i32) {
    %c0_i32 = arith.constant 0 : i32
    %c0_i32_0 = arith.constant 0 : i32
    %c0_i32_1 = arith.constant 0 : i32
    return %c0_i32, %c0_i32_0 : i32, i32
  }
  func.func @transform_1(%arg0: i32) -> (i32, i32, i32) {
    %c0_i32 = arith.constant 0 : i32
    %c0_i32_0 = arith.constant 0 : i32
    %c0_i32_1 = arith.constant 0 : i32
    %c0_i32_2 = arith.constant 0 : i32
    return %c0_i32, %c0_i32_0, %c0_i32_1 : i32, i32, i32
  }
  func.func @transform_2(%arg0: i32) -> (i32, i32, i32) {
    %c0_i32 = arith.constant 0 : i32
    %c0_i32_0 = arith.constant 0 : i32
    %c0_i32_1 = arith.constant 0 : i32
    return %arg0, %c0_i32, %c0_i32_0 : i32, i32, i32
  }
  func.func @transform_3(%arg0: i32) -> (i32, i32, i32) {
    %c0_i32 = arith.constant 0 : i32
    %c0_i32_0 = arith.constant 0 : i32
    %c0_i32_1 = arith.constant 0 : i32
    return %arg0, %c0_i32, %c0_i32_0 : i32, i32, i32
  }
  func.func @transform_4(%arg0: i32) -> (i32, i32, i32) {
    %c0_i32 = arith.constant 0 : i32
    %c0_i32_0 = arith.constant 0 : i32
    %c0_i32_1 = arith.constant 0 : i32
    return %arg0, %c0_i32, %c0_i32_0 : i32, i32, i32
  }
  func.func @transform_5(%arg0: i32) -> (i32, i32, i32) {
    %c0_i32 = arith.constant 0 : i32
    %c0_i32_0 = arith.constant 0 : i32
    %c0_i32_1 = arith.constant 0 : i32
    return %arg0, %c0_i32, %c0_i32_0 : i32, i32, i32
  }
  func.func @transform_6(%arg0: i32) -> (i32, i32, i32) {
    %c0_i32 = arith.constant 0 : i32
    %c0_i32_0 = arith.constant 0 : i32
    %c0_i32_1 = arith.constant 0 : i32
    return %arg0, %c0_i32, %c0_i32_0 : i32, i32, i32
  }
  func.func @transform_7(%arg0: i32) -> (i32, i32, i32) {
    %c0_i32 = arith.constant 0 : i32
    %c0_i32_0 = arith.constant 0 : i32
    %c0_i32_1 = arith.constant 0 : i32
    return %arg0, %c0_i32, %c0_i32_0 : i32, i32, i32
  }
  func.func @transform_8(%arg0: i32) -> (i32, i32, i32) {
    %c0_i32 = arith.constant 0 : i32
    %c0_i32_0 = arith.constant 0 : i32
    %c0_i32_1 = arith.constant 0 : i32
    return %arg0, %c0_i32, %c0_i32_0 : i32, i32, i32
  }
  func.func @transform_9(%arg0: i32) -> (i32, i32, i32) {
    %c0_i32 = arith.constant 0 : i32
    %c0_i32_0 = arith.constant 0 : i32
    %c0_i32_1 = arith.constant 0 : i32
    return %arg0, %c0_i32, %c0_i32_0 : i32, i32, i32
  }
  func.func @transform_10(%arg0: i32) -> (i32, i32, i32) {
    %c0_i32 = arith.constant 0 : i32
    %c0_i32_0 = arith.constant 0 : i32
    %c0_i32_1 = arith.constant 0 : i32
    return %arg0, %c0_i32, %c0_i32_0 : i32, i32, i32
  }
  func.func @transform_11(%arg0: i32) -> (i32, i32, i32) {
    %c0_i32 = arith.constant 0 : i32
    %c0_i32_0 = arith.constant 0 : i32
    %c0_i32_1 = arith.constant 0 : i32
    return %arg0, %c0_i32, %c0_i32_0 : i32, i32, i32
  }
  func.func @transform_12(%arg0: i32) -> (i32, i32, i32) {
    %c0_i32 = arith.constant 0 : i32
    %c0_i32_0 = arith.constant 0 : i32
    %c0_i32_1 = arith.constant 0 : i32
    return %arg0, %c0_i32, %c0_i32_0 : i32, i32, i32
  }
  func.func @transform_13(%arg0: i32) -> (i32, i32, i32) {
    %c0_i32 = arith.constant 0 : i32
    %c0_i32_0 = arith.constant 0 : i32
    %c0_i32_1 = arith.constant 0 : i32
    return %arg0, %c0_i32, %c0_i32_0 : i32, i32, i32
  }
  func.func @transform_14(%arg0: i32) -> (i32, i32) {
    %c0_i32 = arith.constant 0 : i32
    %c0_i32_0 = arith.constant 0 : i32
    %c0_i32_1 = arith.constant 0 : i32
    return %c0_i32, %c0_i32_0 : i32, i32
  }
  func.func @transform_15(%arg0: i32) -> (i32, i32) {
    %c0_i32 = arith.constant 0 : i32
    %c0_i32_0 = arith.constant 0 : i32
    %c0_i32_1 = arith.constant 0 : i32
    return %c0_i32, %c0_i32_0 : i32, i32
  }
  func.func @transform_16(%arg0: i32) -> (i32, i32) {
    %c0_i32 = arith.constant 0 : i32
    %c0_i32_0 = arith.constant 0 : i32
    %c0_i32_1 = arith.constant 0 : i32
    return %c0_i32, %c0_i32_0 : i32, i32
  }
}

</mosaic_0001>

<bundles_post_ra>
// kernel: tpu_custom_call.1
= control target key start
LH: loop header
LB: loop body
LE: loop exit
PB: predicated region body
PF: predicated region fallthrough
CT: control target
= control target key end

     0   :  { %s3943_s0 = inlined_call_operand.vmem [shape: f32[16,32], index: 0, kind: input, shape index: {}]   ;;  %s3944_s1 = inlined_call_operand.vmem [shape: f32[2,8,8], index: 1, kind: input, shape index: {}]   ;;  %s3945_s2 = inlined_call_operand.vmem [shape: f32[2,1,32], index: 2, kind: input, shape index: {}]   ;;  %s3946_s3 = inlined_call_operand.vmem [shape: f32[2,1,32], index: 3, kind: input, shape index: {}]   ;;  %s3947_s4 = inlined_call_operand.vmem [shape: f32[2,32,96], index: 4, kind: input, shape index: {}]   ;;  %s3948_s5 = inlined_call_operand.vmem [shape: f32[2,1,96], index: 5, kind: input, shape index: {}]   ;;  %s3949_s6 = inlined_call_operand.vmem [shape: f32[2,32,32], index: 6, kind: input, shape index: {}]   ;;  %s3950_s7 = inlined_call_operand.vmem [shape: f32[2,1,32], index: 7, kind: input, shape index: {}]   ;;  %s3951_s8 = inlined_call_operand.vmem [shape: f32[2,1,32], index: 8, kind: input, shape index: {}]   ;;  %s3952_s9 = inlined_call_operand.vmem [shape: f32[2,1,32], index: 9, kind: input, shape index: {}]   ;;  %s3953_s10 = inlined_call_operand.vmem [shape: f32[2,32,128], index: 10, kind: input, shape index: {}]   ;;  %s3954_s11 = inlined_call_operand.vmem [shape: f32[2,1,128], index: 11, kind: input, shape index: {}]   ;;  %s3955_s12 = inlined_call_operand.vmem [shape: f32[2,128,32], index: 12, kind: input, shape index: {}]   ;;  %s3956_s13 = inlined_call_operand.vmem [shape: f32[2,1,32], index: 13, kind: input, shape index: {}]   ;;  %s3957_s14 = inlined_call_operand.vmem [shape: f32[1,32], index: 14, kind: input, shape index: {}]   ;;  %s3958_s15 = inlined_call_operand.vmem [shape: f32[1,32], index: 15, kind: input, shape index: {}]   ;;  %s3959_s16 = inlined_call_operand.hbm [shape: f32[16,32], index: 16, kind: output, shape index: {}]  }
   0x1   :  { %3964 = sst [smem:[#allocation8_spill]] %s3943_s0 }
   0x2   :  { %3965 = sst [smem:[#allocation9_spill]] %s3947_s4 }
   0x3   :  { %3966 = sst [smem:[#allocation10_spill]] %s3949_s6 }
   0x4   :  { %3967 = sst [smem:[#allocation11_spill]] %s3957_s14 }
   0x5   :  { %3968 = sst [smem:[#allocation12_spill]] %s3958_s15 }
   0x6   :  { %3969 = sst [smem:[#allocation13_spill]] %s3959_s16 }
   0x7   :  { %21 = vsyncpa [#allocation4], 0  ;;  %s3561_s21 = smov 0  }
   0x8 LB: > { %3970 = sst [smem:[#allocation6_spill]] %s3458_s21  ;;  %s3567_s22 = sadd.s32 4294967295, %s3458_s21   ;;  %s3458_s21 = sphi %s3561_s21, %s27_s21  }
   0x9   : > { %p2986_p0 = scmp.ge.s32.totalorder %s3458_s21, 1  ;;  %p552_p1 = scmp.lt.s32.totalorder %s3458_s21, 3 }
   0xb   : > { %p553_p2 = pnand %p2986_p0, %p552_p1 }
   0xd   : > { %556 = sbr.rel (%p553_p2) target bundleno = 4612 (0x1204), region = 84 }
  0x14   : > { %p636_p3 = scmp.lt.s32.totalorder %s3567_s22, 1  ;;  %s3971_s4 = sld [smem:[#allocation9_spill]] }
  0x15   : > { %s3972_s6 = sld [smem:[#allocation10_spill]]  ;;  %p2995_p4 = scmp.ne.s32.totalorder %s3567_s22, 0 }
  0x16   : > { %s3573_s23 = scalar_select %p636_p3, %s3567_s22, 1 }
  0x17   : > { %683 = sbr.rel (%p2995_p4) target bundleno = 31 (0x1f), region = 88  ;;  %s3974_s19 = sld [smem:[#allocation8_spill]] (!%p2995_p4)  ;;  %vm686_vm0 = vcmask (!%p2995_p4), 261120  }
  0x18   : > { %s3047_s30 = sshll.u32 %s3573_s23, 5  ;;  %s660_s14 = scalar_lea.vmem %s3951_s8, %s3573_s23 }
  0x19   : > { %s663_s18 = scalar_lea.vmem %s3952_s9, %s3573_s23  ;;  %s679_s0 = scalar_lea.vmem %s3956_s13, %s3573_s23 }
  0x1a   : > { %s3591_s24 = scalar_lea.vmem %s3971_s4, %s3047_s30  ;;  %s3613_s4 = scalar_lea.vmem %s3953_s10, %s3047_s30 }
  0x1b   : > { %s3596_s16 = scalar_lea.vmem %s3972_s6, %s3047_s30  ;;  %s671_s6 = scalar_lea.vmem %s3954_s11, %s3573_s23 }
  0x1c   : > { %3973 = sst [smem:[#allocation7_spill]] %s3596_s16  ;;  %s3050_s16 = sshll.u32 %s3573_s23, 7 }
  0x1d   : > { %s3623_s27 = scalar_lea.vmem %s3955_s12, %s3050_s16  ;;  %v684_v0 = vld [vmem:[%s3974_s19] sm:$0xff] (!%p2995_p4)  ;;  %v685_v1 = vld [vmem:[%s3974_s19 + $0x8] sm:$0xff] (!%p2995_p4) }
  0x1e   : > { %687 = vst.msk [vmem:[#allocation2] sm:$0xff] %vm686_vm0, %v684_v0  ;;  %688 = vst.msk [vmem:[#allocation2 + $0x8] sm:$0xff] %vm686_vm0, %v685_v1 }
  0x1f PF: > { %vm693_vm1 = vcmask 261120   ;;  %v751_v16 = vld [vmem:[%s3591_s24] sm:$0xff]  ;;  %v752_v17 = vld [vmem:[%s3591_s24 + $0x8] sm:$0xff]  ;;  %v753_v18 = vld [vmem:[%s3591_s24 + $0x10] sm:$0xff]  ;;  %s3975_s25 = scalar_lea.vmem %s3945_s2, %s3573_s23  ;;  %s3976_s29 = scalar_lea.vmem %s3946_s3, %s3573_s23  ;;  %v3460_v48 = vmov 0.0   ;;  %vm3461_vm6 = vmmov 0  }
  0x20   : > { %v3282_v19 = vpack.c.bf16 %v752_v17, %v751_v16  ;;  %v754_v20 = vld [vmem:[%s3591_s24 + $0x18] sm:$0xff]  ;;  %v2996_v39 = vld [vmem:[%s3975_s25] ss:$0 sm:$0xff]  ;;  %3166 = vmatprep.subr.mxu0 %v3460_v48  ;;  %3168 = vmatprep.mubr.msk.f32.mxu0 %vm3461_vm6, %v3460_v48  ;;  %s3977_s30 = scalar_lea.vmem %s3948_s5, %s3573_s23  ;;  %s3462_s20 = smov 96   ;;  %vm852_vm7 = vcmask 64512   ;;  %v3702_v60 = vld [vmem:[%s3944_s1 + $0x8] sm:$0xff] }
  0x21   : > { %v3286_v21 = vpack.c.bf16 %v754_v20, %v753_v18  ;;  %v2997_v41 = vld [vmem:[%s3976_s29] ss:$0 sm:$0xff]  ;;  %s3463_s15 = smov 64   ;;  %s3464_s26 = smov 88  }
  0x22   : > { %3283 = vmatprep.subr.bf16.mxu1 %v3282_v19  ;;  %v2998_v49 = vld [vmem:[%s3977_s30] ss:$0 sm:$0xff]  ;;  %s3465_s29 = smov 120   ;;  %s3466_s28 = smov 80  }
  0x23   : > { %3285 = vmatpush3.bf16.msra.mxu1 %v3282_v19  ;;  %v3696_v56 = vld [vmem:[%s3944_s1] sm:$0xff]  ;;  %s3467_s17 = smov 56   ;;  %s3468_s30 = smov 112  }
  0x24   : > { %3287 = vmatprep.subr.bf16.mxu1 %v3286_v21  ;;  %s3470_s21 = smov 72   ;;  %s3471_s16 = smov 104  }
  0x25   : > { %v3636_v2 = vld [vmem:[#allocation2] sm:$0xff]  ;;  %v3638_v3 = vld [vmem:[#allocation2 + $0x8] sm:$0xff]  ;;  %s3978_s24 = sld [smem:[#allocation7_spill]]  ;;  %s3472_s25 = smov 40  }
  0x26   : > { %v694_v4 = vsel %vm693_vm1, %v3636_v2, 0.0  ;;  %v697_v5 = vsel %vm693_vm1, %v3638_v3, 0.0  ;;  %p3040_p5 = scmp.ne.s32.totalorder %s3567_s22, 1 }
  0x27   : > { %695 = vadd.xlane.f32.xlu0 %v694_v4  ;;  %3289 = vmatpush3.bf16.msra.mxu1 %v3286_v21 }
  0x28   : > { %3136 = vmatprep.subr.mxu1 %v3460_v48 }
  0x2b   : > { %698 = vadd.xlane.f32.xlu0 %v697_v5 }
  0xb4   : > { %v696_v6 = vpop.xlane.xlu0 %695 }
  0xb5   : > { %v701_v7 = vmul.f32 0.03125, %v696_v6 }
  0xb7   : > { %v703_v8 = vsub.f32 %v3636_v2, %v701_v7 }
  0xb8   : > { %v699_v9 = vpop.xlane.xlu0 %698 }
  0xb9   : > { %v702_v10 = vmul.f32 0.03125, %v699_v9  ;;  %v705_v11 = vmul.f32 %v703_v8, %v703_v8 }
  0xbb   : > { %v704_v12 = vsub.f32 %v3638_v3, %v702_v10  ;;  %v707_v13 = vsel %vm693_vm1, %v705_v11, 0.0 }
  0xbc   : > { %708 = vadd.xlane.f32.xlu1 %v707_v13 }
  0xbd   : > { %v706_v14 = vmul.f32 %v704_v12, %v704_v12 }
  0xbf   : > { %v710_v15 = vsel %vm693_vm1, %v706_v14, 0.0 }
  0xc0   : > { %711 = vadd.xlane.f32.xlu1 %v710_v15 }
 0x149   : > { %v709_v22 = vpop.xlane.xlu1 %708 }
 0x14a   : > { %v713_v23 = vmul.f32 0.03125, %v709_v22 }
 0x14c   : > { %v715_v24 = vadd.f32 1e-06, %v713_v23 }
 0x14d   : > { %v712_v25 = vpop.xlane.xlu1 %711 }
 0x14e   : > { %3366 = vrsqrt.f32 %v715_v24  ;;  %v714_v26 = vmul.f32 0.03125, %v712_v25  ;;  %vm719_vm2 = vcmp.eq.f32.partialorder %v715_v24, inf  ;;  %v722_v30 = vand.u32 2147483648, %v715_v24 }
 0x14f   : > { %vm721_vm3 = vcmp.eq.f32.partialorder %v715_v24, 0.0 }
 0x150   : > { %v716_v27 = vadd.f32 1e-06, %v714_v26 }
 0x152   : > { %3368 = vrsqrt.f32 %v716_v27  ;;  %vm726_vm4 = vcmp.eq.f32.partialorder %v716_v27, inf  ;;  %v729_v35 = vand.u32 2147483648, %v716_v27  ;;  %vm728_vm5 = vcmp.eq.f32.partialorder %v716_v27, 0.0 }
 0x158   : > { %v3367_v28 = vpop.eup %3366 }
 0x159   : > { %v718_v29 = vmul.f32 %v3367_v28, %v715_v24 }
 0x15b   : > { %v720_v31 = vsel %vm719_vm2, %v715_v24, %v718_v29 }
 0x15c   : > { %v3369_v32 = vpop.eup %3368  ;;  %v723_v33 = vsel %vm721_vm3, %v722_v30, %v720_v31 }
 0x15d   : > { %v725_v34 = vmul.f32 %v3369_v32, %v716_v27  ;;  %3370 = vrcp.f32 %v723_v33 }
 0x15f   : > { %v727_v36 = vsel %vm726_vm4, %v716_v27, %v725_v34 }
 0x160   : > { %v730_v37 = vsel %vm728_vm5, %v729_v35, %v727_v36 }
 0x161   : > { %3372 = vrcp.f32 %v730_v37 }
 0x167   : > { %v3371_v38 = vpop.eup %3370 }
 0x168   : > { %v732_v40 = vmul.f32 %v3371_v38, %v703_v8 }
 0x16a   : > { %v741_v42 = vmul.f32 %v2996_v39, %v732_v40 }
 0x16b   : > { %v3373_v43 = vpop.eup %3372 }
 0x16c   : > { %v734_v44 = vmul.f32 %v3373_v43, %v704_v12  ;;  %v749_v45 = vadd.f32 %v2997_v41, %v741_v42 }
 0x16e   : > { %v742_v46 = vmul.f32 %v2996_v39, %v734_v44  ;;  %3133 = vmatprep.mubr.msk.f32.mxu1 %vm693_vm1, %v749_v45 }
 0x170   : > { %v750_v47 = vadd.f32 %v2997_v41, %v742_v46 }
 0x172   : > { %3134 = vmatmul.mubr.msk.f32.vlgmr.msra.gmra.mrb[0].mxu1 %vm693_vm1, %v750_v47 }
 0x173   : > { %3138 = vmatprep.mubr.msk.f32.mxu1 %vm3461_vm6, %v3460_v48 }
 0x245   : > { %v3135_v50 = vpop.f32.mrb[0].mxu1 }
 0x246   : > { %v3675_v51 = vadd.f32 %v3135_v50, %v2998_v49  ;;  %v834_v52 = vpop.f32.mrb[1].mxu1 }
 0x247   : > { %v3677_v53 = vadd.f32 %v2998_v49, %v834_v52 }
 0x248   : > { %928 = vrot.lane.b32.xlu1 %v3675_v51, %s3462_s20 }
 0x249   : > { %850 = vrot.lane.b32.xlu0 %v3677_v53, %s3462_s20  ;;  %s3469_s20 = smov 48  }
 0x2ba   : > { %v929_v55 = vpop.permute.xlu1 %928 }
 0x2bb   : > { %v851_v54 = vpop.permute.xlu0 %850 }
 0x2bc   : > { %3137 = vmatpush3.xpose.msk.msra.mxu1 %vm852_vm7, %v851_v54 }
 0x2bd   : > { %3141 = vmatprep.subr.mxu1 %v3460_v48 }
 0x2bf   : > { %3139 = vmatmul.mubr.msk.f32.vlgmr.msra.gmra.mrb[2].mxu1 %vm852_vm7, %v3677_v53 }
 0x2c0   : > { %3142 = vmatpush3.xpose.msk.msra.mxu1 %vm852_vm7, %v929_v55  ;;  %3143 = vmatprep.mubr.msk.f32.mxu1 %vm3461_vm6, %v3460_v48 }
 0x2c1   : > { %3146 = vmatprep.subr.mxu1 %v3460_v48 }
 0x2c3   : > { %3144 = vmatmul.mubr.msk.f32.vlgmr.msra.gmra.mrb[4].mxu1 %vm852_vm7, %v3675_v51 }
 0x2c4   : > { %3148 = vmatprep.mubr.msk.f32.mxu1 %vm3461_vm6, %v3460_v48 }
 0x392   : > { %v923_v57 = vpop.f32.mrb[2].mxu1 }
 0x393   : > { %v924_v58 = vadd.f32 %v923_v57, %v3696_v56  ;;  %v3140_v59 = vpop.f32.mrb[3].mxu1 }
 0x395   : > { %v1004_v61 = vsel %vm852_vm7, %v924_v58, -inf }
 0x396   : > { %1005 = vmax.xlane.f32.xlu1 %v1004_v61  ;;  %v1000_v62 = vpop.f32.mrb[4].mxu1 }
 0x397   : > { %v1001_v63 = vadd.f32 %v1000_v62, %v3702_v60  ;;  %v3145_v0 = vpop.f32.mrb[5].mxu1 }
 0x399   : > { %v1007_v1 = vsel %vm852_vm7, %v1001_v63, -inf }
 0x39a   : > { %1008 = vmax.xlane.f32.xlu0 %v1007_v1 }
 0x3a7   : > { %1102 = vrot.lane.b32.xlu1 %v3675_v51, %s3463_s15 }
 0x3ab   : > { %1180 = vrot.lane.b32.xlu1 %v3677_v53, %s3464_s26 }
 0x3af   : > { %1178 = vrot.lane.b32.xlu1 %v3677_v53, %s3465_s29 }
 0x423   : > { %v1006_v4 = vpop.xlane.xlu1 %1005 }
 0x424   : > { %v1010_v5 = vsub.f32 %v924_v58, %v1006_v4 }
 0x426   : > { %v1012_v6 = vmul.f32 1.442695, %v1010_v5 }
 0x427   : > { %v1009_v7 = vpop.xlane.xlu0 %1008  ;;  %v1103_v14 = vpop.permute.xlu1 %1102 }
 0x428   : > { %3374 = vpow2.f32 %v1012_v6  ;;  %v1011_v8 = vsub.f32 %v1001_v63, %v1009_v7 }
 0x42a   : > { %v1014_v9 = vmul.f32 1.442695, %v1011_v8 }
 0x42b   : > { %v1181_v15 = vpop.permute.xlu1 %1180 }
 0x42c   : > { %3376 = vpow2.f32 %v1014_v9 }
 0x42f   : > { %v1179_v16 = vpop.permute.xlu1 %1178 }
 0x432   : > { %v3375_v10 = vpop.eup %3374 }
 0x433   : > { %v1016_v11 = vsel %vm852_vm7, %v3375_v10, 0.0 }
 0x434   : > { %1017 = vadd.xlane.f32.xlu0 %v1016_v11 }
 0x436   : > { %v3377_v12 = vpop.eup %3376 }
 0x437   : > { %v1019_v13 = vsel %vm852_vm7, %v3377_v12, 0.0 }
 0x438   : > { %1020 = vadd.xlane.f32.xlu1 %v1019_v13 }
 0x449   : > { %1256 = vrot.lane.b32.xlu1 %v3675_v51, %s3465_s29  ;;  %s3979_s29 = scalar_lea.vmem %s3950_s7, %s3573_s23 }
 0x44a   : > { %1026 = vrot.lane.b32.xlu0 %v3677_v53, %s3463_s15 }
 0x44d   : > { %1672 = vrot.lane.b32.xlu1 %v3677_v53, %s3466_s28 }
 0x44e   : > { %1258 = vrot.lane.b32.xlu0 %v3675_v51, %s3464_s26 }
 0x4c1   : > { %v1018_v17 = vpop.xlane.xlu0 %1017 }
 0x4c2   : > { %3378 = vrcp.f32 %v1018_v17 }
 0x4c5   : > { %v1021_v18 = vpop.xlane.xlu1 %1020  ;;  %v1027_v19 = vpop.permute.xlu0 %1026 }
 0x4c6   : > { %3380 = vrcp.f32 %v1021_v18  ;;  %3147 = vmatpush3.msra.mxu1 %v1027_v19 }
 0x4c7   : > { %3151 = vmatprep.subr.mxu1 %v3460_v48 }
 0x4c9   : > { %v1259_v24 = vpop.permute.xlu0 %1258  ;;  %v1257_v25 = vpop.permute.xlu1 %1256 }
 0x4cc   : > { %v3379_v20 = vpop.eup %3378 }
 0x4cd   : > { %v1023_v21 = vmul.f32 %v3379_v20, %v3375_v10  ;;  %v1673_v44 = vpop.permute.xlu1 %1672 }
 0x4cf   : > { %3149 = vmatmul.mubr.msk.f32.vlgmr.msra.gmra.mrb[6].mxu1 %vm852_vm7, %v1023_v21 }
 0x4d0   : > { %v3381_v22 = vpop.eup %3380  ;;  %3152 = vmatpush3.msra.mxu1 %v1103_v14  ;;  %3153 = vmatprep.mubr.msk.f32.mxu1 %vm3461_vm6, %v3460_v48  ;;  %v846_v14 = vld [vmem:[%s3978_s24 + $0x8] sm:$0xff] }
 0x4d1   : > { %v1025_v23 = vmul.f32 %v3381_v22, %v3377_v12  ;;  %3156 = vmatprep.subr.mxu1 %v3460_v48 }
 0x4d3   : > { %3154 = vmatmul.mubr.msk.f32.vlgmr.msra.gmra.mrb[8].mxu1 %vm852_vm7, %v1025_v23 }
 0x4d4   : > { %3158 = vmatprep.mubr.msk.f32.mxu1 %vm3461_vm6, %v3460_v48 }
 0x4d7   : > { %3157 = vmatpush3.xpose.msk.msra.mxu1 %vm852_vm7, %v1181_v15  ;;  %v845_v15 = vld [vmem:[%s3978_s24] sm:$0xff] }
 0x4d8   : > { %3161 = vmatprep.subr.mxu1 %v3460_v48 }
 0x4da   : > { %3159 = vmatmul.mubr.msk.f32.vlgmr.msra.gmra.mrb[10].mxu1 %vm852_vm7, %v1179_v16 }
 0x4db   : > { %3162 = vmatpush3.xpose.msk.msra.mxu1 %vm852_vm7, %v1259_v24  ;;  %3163 = vmatprep.mubr.msk.f32.mxu1 %vm3461_vm6, %v3460_v48 }
 0x4dc   : > { %3171 = vmatprep.subr.mxu1 %v3460_v48 }
 0x4de   : > { %3164 = vmatmul.mubr.msk.f32.vlgmr.msra.gmra.mrb[12].mxu1 %vm852_vm7, %v1257_v25 }
 0x4df   : > { %3173 = vmatprep.mubr.msk.f32.mxu1 %vm3461_vm6, %v3460_v48 }
 0x5a2   : > { %v3735_v26 = vpop.f32.mrb[6].mxu1 }
 0x5a3   : > { %v3150_v27 = vpop.f32.mrb[7].mxu1 }
 0x5a6   : > { %v3737_v28 = vpop.f32.mrb[8].mxu1 }
 0x5a7   : > { %v3155_v29 = vpop.f32.mrb[9].mxu1 }
 0x5ad   : > { %v1252_v30 = vpop.f32.mrb[10].mxu1 }
 0x5ae   : > { %v3160_v31 = vpop.f32.mrb[11].mxu1  ;;  %v1253_v42 = vadd.f32 %v1252_v30, %v3696_v56 }
 0x5b0   : > { %v1334_v43 = vsel %vm852_vm7, %v1253_v42, -inf }
 0x5b1   : > { %v1330_v32 = vpop.f32.mrb[12].mxu1 }
 0x5b2   : > { %v1331_v33 = vadd.f32 %v1330_v32, %v3702_v60  ;;  %v3165_v34 = vpop.f32.mrb[13].mxu1  ;;  %v847_v32 = vld [vmem:[%s3978_s24 + $0x10] sm:$0xff] }
 0x5b4   : > { %v1337_v35 = vsel %vm852_vm7, %v1331_v33, -inf }
 0x5b5   : > { %1338 = vmax.xlane.f32.xlu0 %v1337_v35 }
 0x5cb   : > { %1432 = vrot.lane.b32.xlu0 %v3675_v51, %s3467_s17 }
 0x5cf   : > { %1670 = vrot.lane.b32.xlu0 %v3677_v53, %s3468_s30 }
 0x5d3   : > { %1748 = vrot.lane.b32.xlu0 %v3675_v51, %s3468_s30 }
 0x642   : > { %v1339_v36 = vpop.xlane.xlu0 %1338 }
 0x643   : > { %v1341_v37 = vsub.f32 %v1331_v33, %v1339_v36 }
 0x645   : > { %v1344_v38 = vmul.f32 1.442695, %v1341_v37 }
 0x646   : > { %v1433_v39 = vpop.permute.xlu0 %1432 }
 0x647   : > { %3382 = vpow2.f32 %v1344_v38  ;;  %3172 = vmatpush3.msra.mxu1 %v1433_v39 }
 0x648   : > { %3186 = vmatprep.subr.mxu1 %v3460_v48 }
 0x64a   : > { %v1671_v49 = vpop.permute.xlu0 %1670 }
 0x64e   : > { %v1749_v52 = vpop.permute.xlu0 %1748 }
 0x651   : > { %v3383_v40 = vpop.eup %3382 }
 0x652   : > { %v1349_v41 = vsel %vm852_vm7, %v3383_v40, 0.0 }
 0x653   : > { %1350 = vadd.xlane.f32.xlu1 %v1349_v41 }
 0x664   : > { %1750 = vrot.lane.b32.xlu1 %v3675_v51, %s3466_s28 }
 0x688   : > { %1335 = vmax.xlane.f32.xlu1 %v1334_v43 }
 0x6e0   : > { %v1351_v45 = vpop.xlane.xlu1 %1350 }
 0x6e1   : > { %3384 = vrcp.f32 %v1351_v45 }
 0x6e4   : > { %v1751_v50 = vpop.permute.xlu1 %1750 }
 0x6eb   : > { %v3385_v46 = vpop.eup %3384 }
 0x6ec   : > { %v1355_v47 = vmul.f32 %v3385_v46, %v3383_v40 }
 0x6ee   : > { %3174 = vmatmul.mubr.msk.f32.vlgmr.msra.gmra.mrb[14].mxu1 %vm852_vm7, %v1355_v47 }
 0x6ef   : > { %3187 = vmatpush3.xpose.msk.msra.mxu1 %vm852_vm7, %v1673_v44  ;;  %3188 = vmatprep.mubr.msk.f32.mxu1 %vm3461_vm6, %v3460_v48 }
 0x6f0   : > { %3191 = vmatprep.subr.mxu1 %v3460_v48 }
 0x6f2   : > { %3189 = vmatmul.mubr.msk.f32.vlgmr.msra.gmra.mrb[16].mxu1 %vm852_vm7, %v1671_v49 }
 0x6f3   : > { %3192 = vmatpush3.xpose.msk.msra.mxu1 %vm852_vm7, %v1751_v50  ;;  %3193 = vmatprep.mubr.msk.f32.mxu1 %vm3461_vm6, %v3460_v48 }
 0x6f4   : > { %3201 = vmatprep.subr.mxu1 %v3460_v48 }
 0x6f6   : > { %3194 = vmatmul.mubr.msk.f32.vlgmr.msra.gmra.mrb[18].mxu1 %vm852_vm7, %v1749_v52 }
 0x6f7   : > { %3203 = vmatprep.mubr.msk.f32.mxu1 %vm3461_vm6, %v3460_v48 }
 0x715   : > { %v1336_v54 = vpop.xlane.xlu1 %1335 }
 0x716   : > { %v1340_v55 = vsub.f32 %v1253_v42, %v1336_v54 }
 0x718   : > { %v1342_v57 = vmul.f32 1.442695, %v1340_v55 }
 0x71a   : > { %3386 = vpow2.f32 %v1342_v57 }
 0x724   : > { %v3387_v58 = vpop.eup %3386 }
 0x725   : > { %v1346_v59 = vsel %vm852_vm7, %v3387_v58, 0.0 }
 0x726   : > { %1347 = vadd.xlane.f32.xlu0 %v1346_v59 }
 0x73c   : > { %1356 = vrot.lane.b32.xlu0 %v3677_v53, %s3467_s17 }
 0x740   : > { %1924 = vrot.lane.b32.xlu0 %v3675_v51, %s3469_s20 }
 0x744   : > { %2085 = vrot.lane.b32.xlu0 %v3677_v53, %s3470_s21 }
 0x748   : > { %2163 = vrot.lane.b32.xlu0 %v3675_v51, %s3470_s21 }
 0x74c   : > { %2083 = vrot.lane.b32.xlu0 %v3677_v53, %s3471_s16 }
 0x7b3   : > { %v1348_v61 = vpop.xlane.xlu0 %1347 }
 0x7b4   : > { %3388 = vrcp.f32 %v1348_v61 }
 0x7b7   : > { %v1357_v62 = vpop.permute.xlu0 %1356 }
 0x7b8   : > { %3167 = vmatpush3.msra.mxu0 %v1357_v62 }
 0x7b9   : > { %3176 = vmatprep.subr.mxu0 %v846_v14 }
 0x7bb   : > { %v1925_v63 = vpop.permute.xlu0 %1924 }
 0x7bc   : > { %3202 = vmatpush3.msra.mxu1 %v1925_v63 }
 0x7bd   : > { %3211 = vmatprep.subr.mxu1 %v3460_v48 }
 0x7be   : > { %v3389_v0 = vpop.eup %3388 }
 0x7bf   : > { %v1353_v1 = vmul.f32 %v3389_v0, %v3387_v58  ;;  %v2086_v34 = vpop.permute.xlu0 %2085 }
 0x7c1   : > { %3169 = vmatmul.mubr.msk.f32.vlgmr.msra.gmra.mrb[0].mxu0 %vm852_vm7, %v1353_v1  ;;  %v1504_v4 = vpop.f32.mrb[14].mxu1 }
 0x7c2   : > { %v3175_v5 = vpop.f32.mrb[15].mxu1  ;;  %3177 = vmatpush3.msra.mxu0 %v846_v14  ;;  %v3033_v14 = vld [vmem:[%s3979_s29] ss:$0 sm:$0xff] }
 0x7c3   : > { %3181 = vmatprep.subr.mxu0 %v845_v15  ;;  %v2164_v37 = vpop.permute.xlu0 %2163 }
 0x7c5   : > { %v1744_v6 = vpop.f32.mrb[16].mxu1 }
 0x7c6   : > { %v1745_v7 = vadd.f32 %v1744_v6, %v3696_v56  ;;  %v3190_v8 = vpop.f32.mrb[17].mxu1 }
 0x7c7   : > { %v2084_v38 = vpop.permute.xlu0 %2083 }
 0x7c8   : > { %v1826_v9 = vsel %vm852_vm7, %v1745_v7, -inf }
 0x7c9   : > { %1827 = vmax.xlane.f32.xlu1 %v1826_v9  ;;  %v1822_v10 = vpop.f32.mrb[18].mxu1  ;;  %v848_v9 = vld [vmem:[%s3978_s24 + $0x18] sm:$0xff]  ;;  %s3981_s24 = sld [smem:[#allocation12_spill]] (!%p3040_p5) }
 0x7ca   : > { %v1823_v11 = vadd.f32 %v1822_v10, %v3702_v60  ;;  %v3195_v12 = vpop.f32.mrb[19].mxu1 }
 0x7cc   : > { %v1829_v13 = vsel %vm852_vm7, %v1823_v11, -inf }
 0x7cd   : > { %1830 = vmax.xlane.f32.xlu1 %v1829_v13 }
 0x856   : > { %v1828_v16 = vpop.xlane.xlu1 %1827 }
 0x857   : > { %v1832_v17 = vsub.f32 %v1745_v7, %v1828_v16 }
 0x859   : > { %v1834_v18 = vmul.f32 1.442695, %v1832_v17 }
 0x85a   : > { %v1831_v19 = vpop.xlane.xlu1 %1830 }
 0x85b   : > { %3390 = vpow2.f32 %v1834_v18  ;;  %v1833_v20 = vsub.f32 %v1823_v11, %v1831_v19 }
 0x85d   : > { %v1836_v21 = vmul.f32 1.442695, %v1833_v20 }
 0x85f   : > { %3392 = vpow2.f32 %v1836_v21 }
 0x865   : > { %v3391_v22 = vpop.eup %3390 }
 0x866   : > { %v1838_v23 = vsel %vm852_vm7, %v3391_v22, 0.0 }
 0x867   : > { %1839 = vadd.xlane.f32.xlu1 %v1838_v23 }
 0x869   : > { %v3393_v24 = vpop.eup %3392 }
 0x86a   : > { %v1841_v25 = vsel %vm852_vm7, %v3393_v24, 0.0 }
 0x86b   : > { %1842 = vadd.xlane.f32.xlu1 %v1841_v25 }
 0x87c   : > { %1848 = vrot.lane.b32.xlu1 %v3677_v53, %s3469_s20 }
 0x880   : > { %2161 = vrot.lane.b32.xlu1 %v3675_v51, %s3471_s16 }
 0x894   : > { %v1428_v27 = vpop.f32.mrb[0].mxu0 }
 0x895   : > { %v3170_v29 = vpop.f32.mrb[1].mxu0  ;;  %3178 = vmatprep.mubr.msk.f32.mxu0 %vm852_vm7, %v1428_v27 }
 0x896   : > { %3179 = vmatmul.mubr.msk.f32.vlgmr.msra.gmra.mrb[2].mxu0 %vm852_vm7, %v1504_v4 }
 0x897   : > { %3183 = vmatprep.mubr.msk.f32.mxu0 %vm852_vm7, %v3735_v26  ;;  %3182 = vmatpush3.msra.mxu0 %v845_v15 }
 0x898   : > { %3196 = vmatprep.subr.mxu0 %v3460_v48 }
 0x89e   : > { %3184 = vmatmul.mubr.msk.f32.vlgmr.msra.gmra.mrb[2].mxu0 %vm852_vm7, %v3737_v28 }
 0x89f   : > { %3198 = vmatprep.mubr.msk.f32.mxu0 %vm3461_vm6, %v3460_v48 }
 0x8f4   : > { %v1840_v30 = vpop.xlane.xlu1 %1839 }
 0x8f5   : > { %3394 = vrcp.f32 %v1840_v30 }
 0x8f8   : > { %v1843_v31 = vpop.xlane.xlu1 %1842 }
 0x8f9   : > { %3396 = vrcp.f32 %v1843_v31 }
 0x8fc   : > { %v1849_v33 = vpop.permute.xlu1 %1848 }
 0x8fd   : > { %3197 = vmatpush3.msra.mxu0 %v1849_v33  ;;  %v2566_v33 = vld [vmem:[%s3613_s4 + $0x8] sm:$0xff] }
 0x8fe   : > { %3206 = vmatprep.subr.mxu0 %v847_v32 }
 0x8ff   : > { %v3395_v35 = vpop.eup %3394 }
 0x900   : > { %v1845_v26 = vmul.f32 %v3395_v35, %v3391_v22  ;;  %v2162_v43 = vpop.permute.xlu1 %2161 }
 0x902   : > { %3199 = vmatmul.mubr.msk.f32.vlgmr.msra.gmra.mrb[4].mxu0 %vm852_vm7, %v1845_v26  ;;  %v2568_v26 = vld [vmem:[%s3613_s4 + $0x18] sm:$0xff] }
 0x903   : > { %v3397_v36 = vpop.eup %3396  ;;  %3207 = vmatpush3.msra.mxu0 %v847_v32  ;;  %v2565_v32 = vld [vmem:[%s3613_s4] sm:$0xff] }
 0x904   : > { %v1847_v28 = vmul.f32 %v3397_v36, %v3393_v24  ;;  %3216 = vmatprep.subr.mxu0 %v3460_v48  ;;  %v3290_v35 = vpack.c.bf16 %v2566_v33, %v2565_v32 }
 0x906   : > { %3204 = vmatmul.mubr.msk.f32.vlgmr.msra.gmra.mrb[20].mxu1 %vm852_vm7, %v1847_v28  ;;  %v2660_v28 = vld [vmem:[%s3623_s27 + $0x8] sm:$0xff] }
 0x907   : > { %3212 = vmatpush3.xpose.msk.msra.mxu1 %vm852_vm7, %v2086_v34  ;;  %3213 = vmatprep.mubr.msk.f32.mxu1 %vm3461_vm6, %v3460_v48  ;;  %v2567_v34 = vld [vmem:[%s3613_s4 + $0x10] sm:$0xff] }
 0x908   : > { %3221 = vmatprep.subr.mxu1 %v3460_v48  ;;  %v3294_v36 = vpack.c.bf16 %v2568_v26, %v2567_v34  ;;  %v3039_v34 = vld [vmem:[%s679_s0] ss:$0 sm:$0xff] }
 0x90a   : > { %3214 = vmatmul.mubr.msk.f32.vlgmr.msra.gmra.mrb[22].mxu1 %vm852_vm7, %v2084_v38  ;;  %v2661_v38 = vld [vmem:[%s3623_s27 + $0x10] sm:$0xff] }
 0x90b   : > { %3223 = vmatprep.mubr.msk.f32.mxu1 %vm3461_vm6, %v3460_v48 }
 0x9d5   : > { %v1920_v39 = vpop.f32.mrb[4].mxu0 }
 0x9d6   : > { %v3200_v40 = vpop.f32.mrb[5].mxu0  ;;  %3208 = vmatprep.mubr.msk.f32.mxu0 %vm852_vm7, %v1920_v39 }
 0x9d7   : > { %v2662_v40 = vld [vmem:[%s3623_s27 + $0x18] sm:$0xff] }
 0x9d9   : > { %v1996_v41 = vpop.f32.mrb[20].mxu1 }
 0x9da   : > { %v3205_v42 = vpop.f32.mrb[21].mxu1  ;;  %3209 = vmatmul.mubr.msk.f32.vlgmr.msra.gmra.mrb[2].mxu0 %vm852_vm7, %v1996_v41  ;;  %v3302_v41 = vpack.c.bf16 %v2662_v40, %v2661_v38 }
 0x9db   : > { %3217 = vmatpush3.xpose.msk.msra.mxu0 %vm852_vm7, %v2164_v37  ;;  %3218 = vmatprep.mubr.msk.f32.mxu0 %vm3461_vm6, %v3460_v48  ;;  %v2659_v37 = vld [vmem:[%s3623_s27] sm:$0xff] }
 0x9dc   : > { %3226 = vmatprep.subr.mxu0 %v3460_v48  ;;  %v3298_v39 = vpack.c.bf16 %v2660_v28, %v2659_v37  ;;  %v2663_v42 = vld [vmem:[%s3623_s27 + $0x20] sm:$0xff] }
 0x9dd   : > { %v2157_v44 = vpop.f32.mrb[22].mxu1 }
 0x9de   : > { %v2158_v45 = vadd.f32 %v2157_v44, %v3696_v56  ;;  %v3215_v46 = vpop.f32.mrb[23].mxu1  ;;  %3219 = vmatmul.mubr.msk.f32.vlgmr.msra.gmra.mrb[6].mxu0 %vm852_vm7, %v2162_v43  ;;  %v2664_v43 = vld [vmem:[%s3623_s27 + $0x28] sm:$0xff] }
 0x9df   : > { %3228 = vmatprep.mubr.msk.f32.mxu0 %vm3461_vm6, %v3460_v48  ;;  %v3306_v44 = vpack.c.bf16 %v2664_v43, %v2663_v42  ;;  %v2666_v46 = vld [vmem:[%s3623_s27 + $0x38] sm:$0xff] }
 0x9e0   : > { %v2239_v47 = vsel %vm852_vm7, %v2158_v45, -inf }
 0x9e1   : > { %2240 = vmax.xlane.f32.xlu0 %v2239_v47 }
 0xa6e   : > { %v2241_v49 = vpop.xlane.xlu0 %2240 }
 0xa6f   : > { %v2245_v50 = vsub.f32 %v2158_v45, %v2241_v49  ;;  %v2665_v45 = vld [vmem:[%s3623_s27 + $0x30] sm:$0xff]  ;;  %v2667_v49 = vld [vmem:[%s3623_s27 + $0x40] sm:$0xff] }
 0xa70   : > { %v3310_v47 = vpack.c.bf16 %v2666_v46, %v2665_v45 }
 0xa71   : > { %v2247_v52 = vmul.f32 1.442695, %v2245_v50  ;;  %v2668_v50 = vld [vmem:[%s3623_s27 + $0x48] sm:$0xff] }
 0xa73   : > { %3398 = vpow2.f32 %v2247_v52  ;;  %v3314_v52 = vpack.c.bf16 %v2668_v50, %v2667_v49 }
 0xa7d   : > { %v3399_v54 = vpop.eup %3398 }
 0xa7e   : > { %v2251_v55 = vsel %vm852_vm7, %v3399_v54, 0.0 }
 0xa7f   : > { %2252 = vadd.xlane.f32.xlu0 %v2251_v55  ;;  %v2670_v55 = vld [vmem:[%s3623_s27 + $0x58] sm:$0xff] }
 0xab1   : > { %v2235_v57 = vpop.f32.mrb[6].mxu0 }
 0xab2   : > { %v2236_v56 = vadd.f32 %v2235_v57, %v3702_v60  ;;  %v3220_v58 = vpop.f32.mrb[7].mxu0 }
 0xab3   : > { %v2672_v58 = vld [vmem:[%s3623_s27 + $0x68] sm:$0xff] }
 0xab4   : > { %v2242_v59 = vsel %vm852_vm7, %v2236_v56, -inf }
 0xab5   : > { %2243 = vmax.xlane.f32.xlu1 %v2242_v59 }
 0xac6   : > { %2337 = vrot.lane.b32.xlu1 %v3675_v51, %s3472_s25 }
 0xb0c   : > { %v2253_v60 = vpop.xlane.xlu0 %2252 }
 0xb42   : > { %v2244_v48 = vpop.xlane.xlu1 %2243 }
 0xb43   : > { %v2246_v61 = vsub.f32 %v2236_v56, %v2244_v48  ;;  %v2671_v56 = vld [vmem:[%s3623_s27 + $0x60] sm:$0xff] }
 0xb44   : > { %v3322_v59 = vpack.c.bf16 %v2672_v58, %v2671_v56 }
 0xb45   : > { %v2249_v62 = vmul.f32 1.442695, %v2246_v61 }
 0xb46   : > { %v2338_v63 = vpop.permute.xlu1 %2337 }
 0xb47   : > { %3400 = vpow2.f32 %v2249_v62  ;;  %3227 = vmatpush3.msra.mxu0 %v2338_v63 }
 0xb48   : > { %3402 = vrcp.f32 %v2253_v60  ;;  %3231 = vmatprep.subr.mxu0 %v848_v9 }
 0xb51   : > { %v3401_v0 = vpop.eup %3400 }
 0xb52   : > { %v2254_v1 = vsel %vm852_vm7, %v3401_v0, 0.0  ;;  %v3403_v5 = vpop.eup %3402 }
 0xb53   : > { %2255 = vadd.xlane.f32.xlu0 %v2254_v1  ;;  %v2258_v6 = vmul.f32 %v3403_v5, %v3399_v54  ;;  %v2669_v54 = vld [vmem:[%s3623_s27 + $0x50] sm:$0xff] }
 0xb54   : > { %v3318_v57 = vpack.c.bf16 %v2670_v55, %v2669_v54 }
 0xb69   : > { %2261 = vrot.lane.b32.xlu0 %v3677_v53, %s3472_s25 }
 0xbe0   : > { %v2256_v4 = vpop.xlane.xlu0 %2255 }
 0xbe1   : > { %3404 = vrcp.f32 %v2256_v4 }
 0xbe4   : > { %v2262_v51 = vpop.permute.xlu0 %2261 }
 0xbe5   : > { %3222 = vmatpush3.msra.mxu1 %v2262_v51 }
 0xbe6   : > { %3224 = vmatmul.mubr.msk.f32.vlgmr.msra.gmra.mrb[24].mxu1 %vm852_vm7, %v2258_v6  ;;  %3291 = vmatprep.subr.bf16.mxu1 %v3290_v35 }
 0xbe7   : > { %3293 = vmatpush3.bf16.msra.mxu1 %v3290_v35 }
 0xbe8   : > { %3295 = vmatprep.subr.bf16.mxu1 %v3294_v36 }
 0xbeb   : > { %v3405_v7 = vpop.eup %3404  ;;  %3297 = vmatpush3.bf16.msra.mxu1 %v3294_v36 }
 0xbec   : > { %v2260_v8 = vmul.f32 %v3405_v7, %v3401_v0 }
 0xbee   : > { %3229 = vmatmul.mubr.msk.f32.vlgmr.msra.gmra.mrb[8].mxu0 %vm852_vm7, %v2260_v8 }
 0xbef   : > { %3232 = vmatpush3.msra.mxu0 %v848_v9 }
 0xbf0   : > { %3299 = vmatprep.subr.bf16.mxu0 %v3298_v39 }
 0xcb9   : > { %v2333_v10 = vpop.f32.mrb[24].mxu1 }
 0xcba   : > { %v3225_v53 = vpop.f32.mrb[25].mxu1  ;;  %3233 = vmatprep.mubr.msk.f32.mxu0 %vm852_vm7, %v2333_v10 }
 0xcc1   : > { %v2409_v11 = vpop.f32.mrb[8].mxu0 }
 0xcc2   : > { %v3230_v12 = vpop.f32.mrb[9].mxu0  ;;  %3234 = vmatmul.mubr.msk.f32.vlgmr.msra.gmra.mrb[2].mxu0 %vm852_vm7, %v2409_v11 }
 0xcc3   : > { %3301 = vmatpush3.bf16.msra.mxu0 %v3298_v39  ;;  %v3034_v12 = vld [vmem:[%s660_s14] ss:$0 sm:$0xff] }
 0xcc4   : > { %3303 = vmatprep.subr.bf16.mxu0 %v3302_v41 }
 0xcc7   : > { %3305 = vmatpush3.bf16.msra.mxu0 %v3302_v41 }
 0xcc8   : > { %3307 = vmatprep.subr.bf16.mxu0 %v3306_v44 }
 0xccb   : > { %3309 = vmatpush3.bf16.msra.mxu0 %v3306_v44 }
 0xccc   : > { %3311 = vmatprep.subr.bf16.mxu0 %v3310_v47 }
 0xccf   : > { %3313 = vmatpush3.bf16.msra.mxu0 %v3310_v47 }
 0xcd0   : > { %3315 = vmatprep.subr.bf16.mxu0 %v3314_v52 }
 0xcd3   : > { %3317 = vmatpush3.bf16.msra.mxu0 %v3314_v52 }
 0xcd4   : > { %3319 = vmatprep.subr.bf16.mxu0 %v3318_v57 }
 0xcd7   : > { %3321 = vmatpush3.bf16.msra.mxu0 %v3318_v57 }
 0xcd8   : > { %3323 = vmatprep.subr.bf16.mxu0 %v3322_v59 }
 0xcdb   : > { %3325 = vmatpush3.bf16.msra.mxu0 %v3322_v59 }
 0xd95   : > { %v3235_v13 = vpop.f32.mrb[2].mxu0 }
 0xd96   : > { %v2497_v15 = vadd.f32 %v3235_v13, %v3638_v3  ;;  %v2485_v16 = vpop.f32.mrb[3].mxu0 }
 0xd97   : > { %v2496_v17 = vadd.f32 %v2485_v16, %v3636_v2  ;;  %v3035_v16 = vld [vmem:[%s663_s18] ss:$0 sm:$0xff] }
 0xd98   : > { %v3836_v18 = vadd.f32 %v3033_v14, %v2497_v15 }
 0xd99   : > { %v3838_v19 = vadd.f32 %v3033_v14, %v2496_v17 }
 0xd9a   : > { %v2512_v20 = vsel %vm693_vm1, %v3836_v18, 0.0 }
 0xd9b   : > { %2513 = vadd.xlane.f32.xlu0 %v2512_v20  ;;  %v2509_v21 = vsel %vm693_vm1, %v3838_v19, 0.0 }
 0xd9c   : > { %2510 = vadd.xlane.f32.xlu1 %v2509_v21 }
 0xe28   : > { %v2514_v22 = vpop.xlane.xlu0 %2513 }
 0xe29   : > { %v2516_v3 = vmul.f32 0.03125, %v2514_v22  ;;  %v2511_v23 = vpop.xlane.xlu1 %2510 }
 0xe2a   : > { %v2515_v2 = vmul.f32 0.03125, %v2511_v23  ;;  %v2674_v23 = vld [vmem:[%s3623_s27 + $0x78] sm:$0xff] }
 0xe2b   : > { %v3845_v24 = vsub.f32 %v3836_v18, %v2516_v3  ;;  %v2673_v3 = vld [vmem:[%s3623_s27 + $0x70] sm:$0xff]  ;;  %s3980_s27 = sld [smem:[#allocation11_spill]] (!%p3040_p5) }
 0xe2c   : > { %v3848_v25 = vsub.f32 %v3838_v19, %v2515_v2  ;;  %v3326_v2 = vpack.c.bf16 %v2674_v23, %v2673_v3 }
 0xe2d   : > { %v2520_v27 = vmul.f32 %v3845_v24, %v3845_v24 }
 0xe2e   : > { %v2519_v29 = vmul.f32 %v3848_v25, %v3848_v25  ;;  %3327 = vmatprep.subr.bf16.mxu0 %v3326_v2 }
 0xe2f   : > { %v2524_v30 = vsel %vm693_vm1, %v2520_v27, 0.0  ;;  %3329 = vmatpush3.bf16.msra.mxu0 %v3326_v2 }
 0xe30   : > { %2525 = vadd.xlane.f32.xlu1 %v2524_v30  ;;  %v2521_v31 = vsel %vm693_vm1, %v2519_v29, 0.0 }
 0xe31   : > { %2522 = vadd.xlane.f32.xlu0 %v2521_v31 }
 0xebd   : > { %v2526_v48 = vpop.xlane.xlu1 %2525 }
 0xebe   : > { %v2528_v61 = vmul.f32 0.03125, %v2526_v48  ;;  %v2523_v62 = vpop.xlane.xlu0 %2522 }
 0xebf   : > { %v2527_v63 = vmul.f32 0.03125, %v2523_v62 }
 0xec0   : > { %v2530_v0 = vadd.f32 1e-06, %v2528_v61 }
 0xec1   : > { %v2529_v1 = vadd.f32 1e-06, %v2527_v63 }
 0xec2   : > { %3406 = vrsqrt.f32 %v2530_v0  ;;  %vm2540_vm8 = vcmp.eq.f32.partialorder %v2530_v0, inf  ;;  %v2543_v6 = vand.u32 2147483648, %v2530_v0  ;;  %vm2542_vm9 = vcmp.eq.f32.partialorder %v2530_v0, 0.0 }
 0xec3   : > { %3408 = vrsqrt.f32 %v2529_v1  ;;  %vm2533_vm10 = vcmp.eq.f32.partialorder %v2529_v1, inf  ;;  %v2536_v8 = vand.u32 2147483648, %v2529_v1  ;;  %vm2535_vm11 = vcmp.eq.f32.partialorder %v2529_v1, 0.0 }
 0xecc   : > { %v3407_v60 = vpop.eup %3406 }
 0xecd   : > { %v3409_v4 = vpop.eup %3408  ;;  %v2539_v5 = vmul.f32 %v3407_v60, %v2530_v0 }
 0xece   : > { %v2532_v51 = vmul.f32 %v3409_v4, %v2529_v1 }
 0xecf   : > { %v2541_v7 = vsel %vm2540_vm8, %v2530_v0, %v2539_v5  ;;  %v3041_v5 = vld [vmem:[%s3980_s27] ss:$0 sm:$0xff] (!%p3040_p5) }
 0xed0   : > { %v2544_v9 = vsel %vm2542_vm9, %v2543_v6, %v2541_v7  ;;  %v2534_v10 = vsel %vm2533_vm10, %v2529_v1, %v2532_v51  ;;  %v3042_v51 = vld [vmem:[%s3981_s24] ss:$0 sm:$0xff] (!%p3040_p5) }
 0xed1   : > { %3410 = vrcp.f32 %v2544_v9  ;;  %v2537_v53 = vsel %vm2535_vm11, %v2536_v8, %v2534_v10 }
 0xed2   : > { %3412 = vrcp.f32 %v2537_v53 }
 0xedb   : > { %v3411_v11 = vpop.eup %3410 }
 0xedc   : > { %v3413_v13 = vpop.eup %3412  ;;  %v2548_v14 = vmul.f32 %v3411_v11, %v3845_v24  ;;  %v3036_v24 = vld [vmem:[%s671_s6] ss:$0 sm:$0xff] }
 0xedd   : > { %v2546_v15 = vmul.f32 %v3413_v13, %v3848_v25 }
 0xede   : > { %v2556_v17 = vmul.f32 %v3034_v12, %v2548_v14 }
 0xedf   : > { %v2555_v20 = vmul.f32 %v3034_v12, %v2546_v15 }
 0xee0   : > { %v2564_v22 = vadd.f32 %v3035_v16, %v2556_v17 }
 0xee1   : > { %v2563_v21 = vadd.f32 %v3035_v16, %v2555_v20 }
 0xee3   : > { %3244 = vmatprep.mubr.msk.f32.mxu1 %vm693_vm1, %v2563_v21 }
 0xee4   : > { %3245 = vmatmul.mubr.msk.f32.vlgmr.msra.gmra.mrb[26].mxu1 %vm693_vm1, %v2564_v22 }
 0xfb7   : > { %v3246_v25 = vpop.f32.mrb[26].mxu1 }
 0xfb8   : > { %v2654_v27 = vadd.f32 %v3246_v25, %v3036_v24  ;;  %v2648_v29 = vpop.f32.mrb[27].mxu1 }
 0xfb9   : > { %v2649_v30 = vadd.f32 %v3036_v24, %v2648_v29 }
 0xfba   : > { %v2658_v32 = vmax.f32 %v2654_v27, 0.0 }
 0xfbb   : > { %v2657_v31 = vmax.f32 %v2649_v30, 0.0 }
 0xfbd   : > { %3279 = vmatprep.mubr.f32.mxu0 %v2657_v31 }
 0xfbe   : > { %3280 = vmatmul.mubr.f32.vlgmr.msra.gmra.mrb[10].mxu0 %v2658_v32 }
0x1091   : > { %v3281_v33 = vpop.f32.mrb[10].mxu0  ;;  %2766 = sbr.rel (%p3040_p5) target bundleno = 4580 (0x11e4), region = 92 }
0x1092   : > { %v2751_v35 = vadd.f32 %v3281_v33, %v3836_v18  ;;  %v2741_v26 = vpop.f32.mrb[11].mxu0 }
0x1093   : > { %v2750_v36 = vadd.f32 %v2741_v26, %v3838_v19 }
0x1094   : > { %v2760_v37 = vadd.f32 %v3039_v34, %v2751_v35 }
0x1095   : > { %v2759_v28 = vadd.f32 %v3039_v34, %v2750_v36 }
0x1096   : > { %2762 = vst.msk [vmem:[#allocation2 + $0x8] sm:$0xff] %vm693_vm1, %v2760_v37  ;;  %v2772_v39 = vsel (!%p3040_p5), %vm693_vm1, %v2760_v37, 0.0 }
0x1097   : > { %2761 = vst.msk [vmem:[#allocation2] sm:$0xff] %vm693_vm1, %v2759_v28  ;;  %v2769_v38 = vsel (!%p3040_p5), %vm693_vm1, %v2759_v28, 0.0 }
0x1098   : > { %2770 = vadd.xlane.f32.xlu0 %v2769_v38 }
0x109c   : > { %2773 = vadd.xlane.f32.xlu0 %v2772_v39 }
0x1125   : > { %v2771_v40 = vpop.xlane.xlu0 %2770 }
0x1126   : > { %v2775_v18 = vmul.f32 0.03125, %v2771_v40 }
0x1128   : > { %v2777_v41 = vsub.f32 %v2759_v28, %v2775_v18 }
0x1129   : > { %v2774_v42 = vpop.xlane.xlu0 %2773 }
0x112a   : > { %v2776_v19 = vmul.f32 0.03125, %v2774_v42  ;;  %v2779_v43 = vmul.f32 %v2777_v41, %v2777_v41 }
0x112c   : > { %v2778_v44 = vsub.f32 %v2760_v37, %v2776_v19  ;;  %v2781_v45 = vsel %vm693_vm1, %v2779_v43, 0.0 }
0x112d   : > { %2782 = vadd.xlane.f32.xlu1 %v2781_v45 }
0x112e   : > { %v2780_v46 = vmul.f32 %v2778_v44, %v2778_v44 }
0x1130   : > { %v2784_v47 = vsel %vm693_vm1, %v2780_v46, 0.0 }
0x1131   : > { %2785 = vadd.xlane.f32.xlu1 %v2784_v47 }
0x11ba   : > { %v2783_v49 = vpop.xlane.xlu1 %2782 }
0x11bb   : > { %v2787_v50 = vmul.f32 0.03125, %v2783_v49 }
0x11bd   : > { %v2789_v52 = vadd.f32 1e-06, %v2787_v50 }
0x11be   : > { %v2786_v54 = vpop.xlane.xlu1 %2785 }
0x11bf   : > { %3414 = vrsqrt.f32 %v2789_v52  ;;  %v2788_v55 = vmul.f32 0.03125, %v2786_v54  ;;  %vm2793_vm12 = vcmp.eq.f32.partialorder %v2789_v52, inf  ;;  %v2796_v59 = vand.u32 2147483648, %v2789_v52 }
0x11c0   : > { %vm2795_vm13 = vcmp.eq.f32.partialorder %v2789_v52, 0.0 }
0x11c1   : > { %v2790_v57 = vadd.f32 1e-06, %v2788_v55 }
0x11c3   : > { %3416 = vrsqrt.f32 %v2790_v57  ;;  %vm2800_vm14 = vcmp.eq.f32.partialorder %v2790_v57, inf  ;;  %v2803_v0 = vand.u32 2147483648, %v2790_v57  ;;  %vm2802_vm15 = vcmp.eq.f32.partialorder %v2790_v57, 0.0 }
0x11c9   : > { %v3415_v56 = vpop.eup %3414 }
0x11ca   : > { %v2792_v58 = vmul.f32 %v3415_v56, %v2789_v52 }
0x11cc   : > { %v2794_v48 = vsel %vm2793_vm12, %v2789_v52, %v2792_v58 }
0x11cd   : > { %v2797_v61 = vsel %vm2795_vm13, %v2796_v59, %v2794_v48  ;;  %v3417_v62 = vpop.eup %3416 }
0x11ce   : > { %3418 = vrcp.f32 %v2797_v61  ;;  %v2799_v63 = vmul.f32 %v3417_v62, %v2790_v57 }
0x11d0   : > { %v2801_v1 = vsel %vm2800_vm14, %v2790_v57, %v2799_v63 }
0x11d1   : > { %v2804_v60 = vsel %vm2802_vm15, %v2803_v0, %v2801_v1 }
0x11d2   : > { %3420 = vrcp.f32 %v2804_v60 }
0x11d8   : > { %v3419_v4 = vpop.eup %3418 }
0x11d9   : > { %v2806_v6 = vmul.f32 %v3419_v4, %v2777_v41 }
0x11db   : > { %v2815_v7 = vmul.f32 %v3041_v5, %v2806_v6 }
0x11dc   : > { %v3421_v8 = vpop.eup %3420 }
0x11dd   : > { %v2823_v9 = vadd.f32 %v3042_v51, %v2815_v7  ;;  %v2808_v10 = vmul.f32 %v3421_v8, %v2778_v44 }
0x11df   : > { %2825 = vst.msk [vmem:[#allocation3] sm:$0xff] %vm693_vm1, %v2823_v9  ;;  %v2816_v53 = vmul.f32 %v3041_v5, %v2808_v10 }
0x11e1   : > { %v2824_v11 = vadd.f32 %v3042_v51, %v2816_v53 }
0x11e3   : > { %2826 = vst.msk [vmem:[#allocation3 + $0x8] sm:$0xff] %vm693_vm1, %v2824_v11 }
0x11e4 PF: > { %p3340_p6 = scmp.eq.s32.totalorder %s3567_s22, 1  ;;  %s3473_s25 = smov [#allocation3]  }
0x11e5   : > { %s2833_s15 = sshll.u32 %s3473_s25, 4  ;;  %s2834_s15 = int_to_ptr.vmem [resolvable:$true] %s2833_s15 }
0x11e6   : > { %s3422_s26 = scalar_lea.vmem %s2834_s15, 256  ;;  %p3429_p10 = scmp.lt.s32.totalorder %s2834_s15, %s2834_s15 }
0x11e7   : > { %p3423_p7 = scmp.ne.s32.totalorder %s2834_s15, %s3422_s26  ;;  %p3430_p11 = scmp.lt.s32.totalorder %s3422_s26, %s3422_s26 }
0x11e9   : > { %p3424_p8 = pnand %p3423_p7, %p3340_p6  ;;  %p3431_p12 = por %p3430_p11, %p3429_p10 }
0x11eb   : > { %p3425_p9 = pneg %p3424_p8 }
0x11ed   : > { %p3432_p13 = pnand %p3431_p12, %p3425_p9 }
0x11ef   : > { %3435 = shalt.err (!%p3432_p13)
}
0x11f0   : > { %s3982_s28 = sld [smem:[#allocation13_spill]] }
0x11f6   : > { %s3436_s17 = scalar_lea.hbm %s3982_s28, 256 }
0x11f7   : > { %p3437_p0 = scmp.ne.s32.totalorder %s3982_s28, %s3436_s17  ;;  %p3442_p3 = scmp.lt.u32.totalorder %s3436_s17, %s3982_s28 }
0x11f9   : > { %p3438_p1 = pnand %p3437_p0, %p3340_p6 }
0x11fb   : > { %p3439_p2 = pneg %p3438_p1 }
0x11fd   : > { %p3444_p4 = pnand %p3442_p3, %p3439_p2 }
0x11ff   : > { %3447 = shalt.err (!%p3444_p4)
}
0x1200   : > { %s3474_s21 = smov 128   ;;  %s3475_s6 = smov 8  }
0x1201   : > { %3337 = dma.vmem_to_hbm [thread:$0]  (%p3340_p6), %s2834_s15, 256, %s3982_s28, [#allocation4], %s3474_s21, %s3474_s21, %s3475_s6  }
0x1202   : > { %3453 = dma.done.wait (%p3340_p6), [#allocation4], 256  }
0x1203   : > { %3455 = vsyncadd (%p3340_p6), [#allocation4], 4294967040 }
0x1204 PF: > { %s3983_s0 = sld [smem:[#allocation6_spill]] }
0x120a   : > { %s27_s21 = sadd.s32 1, %s3983_s0  }
0x120b   : > { %p24_p5 = scmp.ge.s32.totalorder %s27_s21, 4  }
0x120d   :  { %26 = sbr.rel (!%p24_p5) target bundleno = 8 (0x8), region = 152 }
0x1214   :  { %2849 = vsyncpa [#allocation4], 1 }
0x1215   :  { %2851 = vsyncpa [#allocation4 + $0x1], 1 }

</bundles_post_ra>
